<compile_context>
chip_gen: v7x
topology: tpu7x:2x2x1
jax: 0.10.0
libtpu: 0.0.40
codegen_flags: <defaults>
</compile_context>

<pallas_src>
import jax
import jax.numpy as jnp
import numpy as np
from jax.experimental import pallas as pl
from jax.experimental.pallas import tpu as pltpu

# ---- model hyper-parameters (small, consistent with the module) -------------
V = 50          # n_vocab
E = 16          # embedding_dim
H = 32          # hidden_dim
C = 5           # n_classes
N_LAYERS = 1    # single layer (LSTM internal dropout therefore 0)
B = 2           # batch
T = 8           # sequence length
DROPOUT = 0.3   # eval-mode dropout == identity

OUT_LANES = 128  # lane-dense fused head output width (>= C + 1)


def review_classifier_kernel(
    ids_ref,     # SMEM (B_pad*T,) int32  scalar-prefetched token ids, row-major (b, t)
    gtabf_ref,   # VMEM (Vp, 4H) f32      emb @ W_ih_f^T + b_ih_f + b_hh_f
    gtabb_ref,   # VMEM (Vp, 4H) f32      emb @ W_ih_b^T + b_ih_b + b_hh_b
    whhf_ref,    # VMEM (H, 4H)           forward W_hh^T
    whf_ref,     # VMEM (H, OUT_LANES)    fused head weight rows for h_f (lane padded)
    whb_ref,     # VMEM (H, OUT_LANES)    fused head weight rows for h_b (lane padded)
    bh_ref,      # VMEM (1, OUT_LANES)    fused head bias (lane padded)
    out_ref,     # VMEM (B_TILE, OUT_LANES) fused [classes | logit | 0-pad]
    gates_s,     # VMEM scratch ((T+1)*B_TILE, 4H): rows [t*Bt : (t+1)*Bt] = fwd
                 #   gates at step t; rows [T*Bt : (T+1)*Bt] = bwd gates at t=T-1
):
    Bt = out_ref.shape[0]
    Hn = whhf_ref.shape[0]              # hidden
    Tn = gates_s.shape[0] // Bt - 1     # sequence length
    row0 = pl.program_id(0) * Bt        # first batch row of this tile

    # --- Embedding + input projection folded into a table gather: for each
    #     (batch row, timestep) copy one pre-projected gate row (bias already
    #     folded in) from the VMEM-resident table into the gates scratch.
    #     Forward gates for all T steps; backward gates only for t = T-1.
    for b in range(Bt):                  # static trip counts (Bt, Tn small)
        base = (row0 + b) * Tn
        for t in range(Tn):
            tok = ids_ref[base + t]
            gates_s[pl.ds(t * Bt + b, 1), :] = gtabf_ref[pl.ds(tok, 1), :]
        tok_last = ids_ref[base + Tn - 1]
        gates_s[pl.ds(Tn * Bt + b, 1), :] = gtabb_ref[pl.ds(tok_last, 1), :]

    whhf = whhf_ref[...]

    # --- forward direction: only h @ W_hh remains inside the loop ------------
    h_f = jnp.zeros((Bt, Hn), jnp.float32)
    c_f = jnp.zeros((Bt, Hn), jnp.float32)
    for t in range(Tn):                  # static trip count
        gates = gates_s[pl.ds(t * Bt, Bt), :] + jnp.dot(
            h_f, whhf, preferred_element_type=jnp.float32)
        sg = jax.nn.sigmoid(gates)       # one full-vreg sigmoid for i/f/o
        i_g = sg[:, 0 * Hn:1 * Hn]
        f_g = sg[:, 1 * Hn:2 * Hn]
        o_g = sg[:, 3 * Hn:4 * Hn]
        g_g = jnp.tanh(gates[:, 2 * Hn:3 * Hn])   # tanh only on the g slice
        c_f = f_g * c_f + i_g * g_g
        h_f = o_g * jnp.tanh(c_f)

    # --- backward direction: only its first step (t = T-1) contributes to
    #     lstm_out[:, -1, :]; with zero initial state the W_hh_b term and the
    #     f*c term are exactly zero, so no recurrent matmul is needed.
    gb = gates_s[pl.ds(Tn * Bt, Bt), :]
    i_b = jax.nn.sigmoid(gb[:, 0 * Hn:1 * Hn])
    g_b = jnp.tanh(gb[:, 2 * Hn:3 * Hn])
    o_b = jax.nn.sigmoid(gb[:, 3 * Hn:4 * Hn])
    h_b = o_b * jnp.tanh(i_b * g_b)

    # --- fused heads, split-row contraction (no lane concat of [h_f|h_b]),
    #     single lane-dense (Bt, 128) store.  Dropout: eval mode -> identity.
    out_ref[...] = (
        jnp.dot(h_f, whf_ref[...], preferred_element_type=jnp.float32)
        + jnp.dot(h_b, whb_ref[...], preferred_element_type=jnp.float32)
        + bh_ref[...]
    )


def init_params(key):
    ks = jax.random.split(key, 12)
    scale = 1.0 / np.sqrt(H)

    def uni(k, shape):
        return jax.random.uniform(k, shape, jnp.float32, -scale, scale)

    emb = jax.random.normal(ks[0], (V, E), jnp.float32) * 0.1
    emb = emb.at[0].set(0.0)  # padding_idx=0 row is zero

    return {
        "embedding": emb,
        # forward direction
        "w_ih_f": uni(ks[1], (4 * H, E)),
        "w_hh_f": uni(ks[2], (4 * H, H)),
        "b_ih_f": uni(ks[3], (4 * H,)),
        "b_hh_f": uni(ks[4], (4 * H,)),
        # backward direction
        "w_ih_b": uni(ks[5], (4 * H, E)),
        "w_hh_b": uni(ks[6], (4 * H, H)),
        "b_ih_b": uni(ks[7], (4 * H,)),
        "b_hh_b": uni(ks[8], (4 * H,)),
        # heads
        "w_multi": uni(ks[9], (C, 2 * H)),
        "b_multi": uni(ks[10], (C,)),
        "w_bin": uni(ks[11], (1, 2 * H)),
        "b_bin": jnp.zeros((1,), jnp.float32),
    }


def prepare_inference_weights(params):
    """One-time weight prep (hoisted out of the per-call forward path)."""
    v_dim, _ = params["embedding"].shape
    h_dim = params["w_hh_f"].shape[1]
    c_dim = params["w_multi"].shape[0]
    v_pad = ((v_dim + 7) // 8) * 8

    emb = params["embedding"]
    # Gate tables: table[v] = emb[v] @ W_ih^T + b_ih + b_hh  (bias folded once).
    gtabf = emb @ params["w_ih_f"].T + (params["b_ih_f"] + params["b_hh_f"])[None, :]
    gtabb = emb @ params["w_ih_b"].T + (params["b_ih_b"] + params["b_hh_b"])[None, :]
    gtabf = jnp.pad(gtabf, ((0, v_pad - v_dim), (0, 0))).astype(jnp.float32)
    gtabb = jnp.pad(gtabb, ((0, v_pad - v_dim), (0, 0))).astype(jnp.float32)

    whhf = params["w_hh_f"].T.astype(jnp.float32)                  # (H, 4H)

    # Fused, lane-padded classifier head: columns [0:C] = multi, [C] = binary.
    head_w = jnp.zeros((2 * h_dim, OUT_LANES), jnp.float32)
    head_w = head_w.at[:, :c_dim].set(params["w_multi"].T)
    head_w = head_w.at[:, c_dim].set(params["w_bin"][0])
    head_b = jnp.zeros((1, OUT_LANES), jnp.float32)
    head_b = head_b.at[0, :c_dim].set(params["b_multi"])
    head_b = head_b.at[0, c_dim].set(params["b_bin"][0])

    return {
        "gtabf": gtabf, "gtabb": gtabb, "whhf": whhf,
        "whf": head_w[:h_dim], "whb": head_w[h_dim:], "head_b": head_b,
    }


def review_classifier_forward(prepped, token_ids):
    b_in, t_len = token_ids.shape

    # Batch tile: sublane-aligned, grows with batch to fill MXU rows.
    b_tile = min(128, ((b_in + 7) // 8) * 8)
    b_pad = ((b_in + b_tile - 1) // b_tile) * b_tile

    ids = token_ids.astype(jnp.int32)
    if b_pad != b_in:
        ids = jnp.pad(ids, ((0, b_pad - b_in), (0, 0)))   # pad tokens are id 0
    ids_flat = ids.reshape(-1)                            # (B_pad*T,) for SMEM

    grid = (b_pad // b_tile,)
    out = pl.pallas_call(
        review_classifier_kernel,
        out_shape=jax.ShapeDtypeStruct((b_pad, OUT_LANES), jnp.float32),
        grid_spec=pltpu.PrefetchScalarGridSpec(
            num_scalar_prefetch=1,          # token ids -> SMEM
            grid=grid,
            in_specs=[
                # weights/tables: constant index maps -> VMEM-resident
                pl.BlockSpec(prepped["gtabf"].shape, lambda i, ids_r: (0, 0)),
                pl.BlockSpec(prepped["gtabb"].shape, lambda i, ids_r: (0, 0)),
                pl.BlockSpec(prepped["whhf"].shape, lambda i, ids_r: (0, 0)),
                pl.BlockSpec(prepped["whf"].shape, lambda i, ids_r: (0, 0)),
                pl.BlockSpec(prepped["whb"].shape, lambda i, ids_r: (0, 0)),
                pl.BlockSpec(prepped["head_b"].shape, lambda i, ids_r: (0, 0)),
            ],
            out_specs=pl.BlockSpec((b_tile, OUT_LANES), lambda i, ids_r: (i, 0)),
            scratch_shapes=[
                pltpu.VMEM(((t_len + 1) * b_tile, 4 * H), jnp.float32)],
        ),
        compiler_params=pltpu.CompilerParams(
            # One grid step at B=2 (single core); shards across TCs on v7x
            # once batch spans multiple tiles.
            dimension_semantics=("parallel",)),
    )(ids_flat, prepped["gtabf"], prepped["gtabb"], prepped["whhf"],
      prepped["whf"], prepped["whb"], prepped["head_b"])

    classes = out[:b_in, :C]
    logits = out[:b_in, C:C + 1]
    return classes, logits


def reference_forward(params, token_ids):
    """Pure-JAX reference mirroring torch semantics (full backward pass)."""
    emb = params["embedding"][token_ids]
    bf = params["b_ih_f"] + params["b_hh_f"]
    bb = params["b_ih_b"] + params["b_hh_b"]

    def cell(x_t, h, c, w_ih, w_hh, b):
        gates = x_t @ w_ih.T + h @ w_hh.T + b
        i, f, g, o = jnp.split(gates, 4, axis=-1)
        c_new = jax.nn.sigmoid(f) * c + jax.nn.sigmoid(i) * jnp.tanh(g)
        h_new = jax.nn.sigmoid(o) * jnp.tanh(c_new)
        return h_new, c_new

    batch = emb.shape[0]
    h = jnp.zeros((batch, H)); c = jnp.zeros((batch, H))
    fwd_outs = []
    for t in range(T):
        h, c = cell(emb[:, t, :], h, c, params["w_ih_f"], params["w_hh_f"], bf)
        fwd_outs.append(h)
    hb = jnp.zeros((batch, H)); cb = jnp.zeros((batch, H))
    bwd_outs = [None] * T
    for t in range(T - 1, -1, -1):
        hb, cb = cell(emb[:, t, :], hb, cb, params["w_ih_b"], params["w_hh_b"], bb)
        bwd_outs[t] = hb
    last = jnp.concatenate([fwd_outs[-1], bwd_outs[-1]], axis=-1)
    classes = last @ params["w_multi"].T + params["b_multi"]
    logits = last @ params["w_bin"].T + params["b_bin"]
    return classes, logits


if __name__ == "__main__":
    key = jax.random.PRNGKey(0)
    pkey, dkey = jax.random.split(key)
    params = init_params(pkey)

    token_ids = jax.random.randint(dkey, (B, T), 0, V, dtype=jnp.int32)

    # Weight prep runs ONCE (not on the per-call forward path).
    prepped = jax.tree_util.tree_map(jnp.asarray, prepare_inference_weights(params))
    jax.block_until_ready(prepped)

    forward = jax.jit(review_classifier_forward)
    classes, logits = forward(prepped, token_ids)
    jax.block_until_ready((classes, logits))

    ref_classes, ref_logits = reference_forward(params, token_ids)
    assert classes.shape == (B, C) and logits.shape == (B, 1)
    np.testing.assert_allclose(np.asarray(classes), np.asarray(ref_classes),
                               rtol=1e-4, atol=1e-4)
    np.testing.assert_allclose(np.asarray(logits), np.asarray(ref_logits),
                               rtol=1e-4, atol=1e-4)

    print("KERNEL_OK")
</pallas_src>

<mosaic_0001>
module attributes {stable_mosaic.version = 11 : i64} {
  func.func @review_classifier_kernel(%arg0: i32, %arg1: memref<64xi32, #tpu.memory_space<smem>>, %arg2: memref<56x128xf32, #tpu.memory_space<vmem>>, %arg3: memref<56x128xf32, #tpu.memory_space<vmem>>, %arg4: memref<32x128xf32, #tpu.memory_space<vmem>>, %arg5: memref<32x128xf32, #tpu.memory_space<vmem>>, %arg6: memref<32x128xf32, #tpu.memory_space<vmem>>, %arg7: memref<1x128xf32, #tpu.memory_space<vmem>>, %arg8: memref<8x128xf32, #tpu.memory_space<vmem>>, %arg9: memref<72x128xf32, #tpu.memory_space<vmem>>) attributes {dimension_semantics = [#tpu.dimension_semantics<parallel>], iteration_bounds = array<i64: 1>, scalar_prefetch = 1 : i64, scratch_operands = 1 : i64, tpu.core_type = #tpu.core_type<tc>, window_params = [{pipeline_mode = #tpu.pipeline_mode<synchronous>, transform_indices = @transform_0, window_bounds = array<i64: 56, 128>}, {pipeline_mode = #tpu.pipeline_mode<synchronous>, transform_indices = @transform_1, window_bounds = array<i64: 56, 128>}, {pipeline_mode = #tpu.pipeline_mode<synchronous>, transform_indices = @transform_2, window_bounds = array<i64: 32, 128>}, {pipeline_mode = #tpu.pipeline_mode<synchronous>, transform_indices = @transform_3, window_bounds = array<i64: 32, 128>}, {pipeline_mode = #tpu.pipeline_mode<synchronous>, transform_indices = @transform_4, window_bounds = array<i64: 32, 128>}, {pipeline_mode = #tpu.pipeline_mode<synchronous>, transform_indices = @transform_5, window_bounds = array<i64: 1, 128>}, {transform_indices = @transform_6, window_bounds = array<i64: 8, 128>}]} {
    %c8_i32 = arith.constant 8 : i32
    %0 = arith.muli %arg0, %c8_i32 : i32
    %c0_i32 = arith.constant 0 : i32
    %1 = arith.addi %0, %c0_i32 : i32
    %c8_i32_0 = arith.constant 8 : i32
    %2 = arith.muli %1, %c8_i32_0 : i32
    %c0_i32_1 = arith.constant 0 : i32
    %3 = arith.addi %2, %c0_i32_1 : i32
    %4 = arith.index_cast %3 : i32 to index
    %5 = memref.load %arg1[%4] : memref<64xi32, #tpu.memory_space<smem>>
    %6 = arith.index_cast %5 : i32 to index
    %c0 = arith.constant 0 : index
    %7 = vector.load %arg2[%6, %c0] : memref<56x128xf32, #tpu.memory_space<vmem>>, vector<1x128xf32>
    %c0_2 = arith.constant 0 : index
    %c0_3 = arith.constant 0 : index
    %8 = vector.load %arg9[%c0_2, %c0_3] : memref<72x128xf32, #tpu.memory_space<vmem>>, vector<1x128xf32>
    tpu.vector_store %arg9[%c0_2, %c0_3], %7 {strides = array<i32>} : memref<72x128xf32, #tpu.memory_space<vmem>>, vector<1x128xf32>,
    %c1_i32 = arith.constant 1 : i32
    %9 = arith.addi %2, %c1_i32 : i32
    %10 = arith.index_cast %9 : i32 to index
    %11 = memref.load %arg1[%10] : memref<64xi32, #tpu.memory_space<smem>>
    %12 = arith.index_cast %11 : i32 to index
    %c0_4 = arith.constant 0 : index
    %13 = vector.load %arg2[%12, %c0_4] : memref<56x128xf32, #tpu.memory_space<vmem>>, vector<1x128xf32>
    %c8 = arith.constant 8 : index
    %c0_5 = arith.constant 0 : index
    %14 = vector.load %arg9[%c8, %c0_5] : memref<72x128xf32, #tpu.memory_space<vmem>>, vector<1x128xf32>
    tpu.vector_store %arg9[%c8, %c0_5], %13 {strides = array<i32>} : memref<72x128xf32, #tpu.memory_space<vmem>>, vector<1x128xf32>,
    %c2_i32 = arith.constant 2 : i32
    %15 = arith.addi %2, %c2_i32 : i32
    %16 = arith.index_cast %15 : i32 to index
    %17 = memref.load %arg1[%16] : memref<64xi32, #tpu.memory_space<smem>>
    %18 = arith.index_cast %17 : i32 to index
    %c0_6 = arith.constant 0 : index
    %19 = vector.load %arg2[%18, %c0_6] : memref<56x128xf32, #tpu.memory_space<vmem>>, vector<1x128xf32>
    %c16 = arith.constant 16 : index
    %c0_7 = arith.constant 0 : index
    %20 = vector.load %arg9[%c16, %c0_7] : memref<72x128xf32, #tpu.memory_space<vmem>>, vector<1x128xf32>
    tpu.vector_store %arg9[%c16, %c0_7], %19 {strides = array<i32>} : memref<72x128xf32, #tpu.memory_space<vmem>>, vector<1x128xf32>,
    %c3_i32 = arith.constant 3 : i32
    %21 = arith.addi %2, %c3_i32 : i32
    %22 = arith.index_cast %21 : i32 to index
    %23 = memref.load %arg1[%22] : memref<64xi32, #tpu.memory_space<smem>>
    %24 = arith.index_cast %23 : i32 to index
    %c0_8 = arith.constant 0 : index
    %25 = vector.load %arg2[%24, %c0_8] : memref<56x128xf32, #tpu.memory_space<vmem>>, vector<1x128xf32>
    %c24 = arith.constant 24 : index
    %c0_9 = arith.constant 0 : index
    %26 = vector.load %arg9[%c24, %c0_9] : memref<72x128xf32, #tpu.memory_space<vmem>>, vector<1x128xf32>
    tpu.vector_store %arg9[%c24, %c0_9], %25 {strides = array<i32>} : memref<72x128xf32, #tpu.memory_space<vmem>>, vector<1x128xf32>,
    %c4_i32 = arith.constant 4 : i32
    %27 = arith.addi %2, %c4_i32 : i32
    %28 = arith.index_cast %27 : i32 to index
    %29 = memref.load %arg1[%28] : memref<64xi32, #tpu.memory_space<smem>>
    %30 = arith.index_cast %29 : i32 to index
    %c0_10 = arith.constant 0 : index
    %31 = vector.load %arg2[%30, %c0_10] : memref<56x128xf32, #tpu.memory_space<vmem>>, vector<1x128xf32>
    %c32 = arith.constant 32 : index
    %c0_11 = arith.constant 0 : index
    %32 = vector.load %arg9[%c32, %c0_11] : memref<72x128xf32, #tpu.memory_space<vmem>>, vector<1x128xf32>
    tpu.vector_store %arg9[%c32, %c0_11], %31 {strides = array<i32>} : memref<72x128xf32, #tpu.memory_space<vmem>>, vector<1x128xf32>,
    %c5_i32 = arith.constant 5 : i32
    %33 = arith.addi %2, %c5_i32 : i32
    %34 = arith.index_cast %33 : i32 to index
    %35 = memref.load %arg1[%34] : memref<64xi32, #tpu.memory_space<smem>>
    %36 = arith.index_cast %35 : i32 to index
    %c0_12 = arith.constant 0 : index
    %37 = vector.load %arg2[%36, %c0_12] : memref<56x128xf32, #tpu.memory_space<vmem>>, vector<1x128xf32>
    %c40 = arith.constant 40 : index
    %c0_13 = arith.constant 0 : index
    %38 = vector.load %arg9[%c40, %c0_13] : memref<72x128xf32, #tpu.memory_space<vmem>>, vector<1x128xf32>
    tpu.vector_store %arg9[%c40, %c0_13], %37 {strides = array<i32>} : memref<72x128xf32, #tpu.memory_space<vmem>>, vector<1x128xf32>,
    %c6_i32 = arith.constant 6 : i32
    %39 = arith.addi %2, %c6_i32 : i32
    %40 = arith.index_cast %39 : i32 to index
    %41 = memref.load %arg1[%40] : memref<64xi32, #tpu.memory_space<smem>>
    %42 = arith.index_cast %41 : i32 to index
    %c0_14 = arith.constant 0 : index
    %43 = vector.load %arg2[%42, %c0_14] : memref<56x128xf32, #tpu.memory_space<vmem>>, vector<1x128xf32>
    %c48 = arith.constant 48 : index
    %c0_15 = arith.constant 0 : index
    %44 = vector.load %arg9[%c48, %c0_15] : memref<72x128xf32, #tpu.memory_space<vmem>>, vector<1x128xf32>
    tpu.vector_store %arg9[%c48, %c0_15], %43 {strides = array<i32>} : memref<72x128xf32, #tpu.memory_space<vmem>>, vector<1x128xf32>,
    %c7_i32 = arith.constant 7 : i32
    %45 = arith.addi %2, %c7_i32 : i32
    %46 = arith.index_cast %45 : i32 to index
    %47 = memref.load %arg1[%46] : memref<64xi32, #tpu.memory_space<smem>>
    %48 = arith.index_cast %47 : i32 to index
    %c0_16 = arith.constant 0 : index
    %49 = vector.load %arg2[%48, %c0_16] : memref<56x128xf32, #tpu.memory_space<vmem>>, vector<1x128xf32>
    %c56 = arith.constant 56 : index
    %c0_17 = arith.constant 0 : index
    %50 = vector.load %arg9[%c56, %c0_17] : memref<72x128xf32, #tpu.memory_space<vmem>>, vector<1x128xf32>
    tpu.vector_store %arg9[%c56, %c0_17], %49 {strides = array<i32>} : memref<72x128xf32, #tpu.memory_space<vmem>>, vector<1x128xf32>,
    %c8_i32_18 = arith.constant 8 : i32
    %51 = arith.addi %2, %c8_i32_18 : i32
    %c1_i32_19 = arith.constant 1 : i32
    %52 = arith.subi %51, %c1_i32_19 : i32
    %53 = arith.index_cast %52 : i32 to index
    %54 = memref.load %arg1[%53] : memref<64xi32, #tpu.memory_space<smem>>
    %55 = arith.index_cast %54 : i32 to index
    %c0_20 = arith.constant 0 : index
    %56 = vector.load %arg3[%55, %c0_20] : memref<56x128xf32, #tpu.memory_space<vmem>>, vector<1x128xf32>
    %c64 = arith.constant 64 : index
    %c0_21 = arith.constant 0 : index
    %57 = vector.load %arg9[%c64, %c0_21] : memref<72x128xf32, #tpu.memory_space<vmem>>, vector<1x128xf32>
    tpu.vector_store %arg9[%c64, %c0_21], %56 {strides = array<i32>} : memref<72x128xf32, #tpu.memory_space<vmem>>, vector<1x128xf32>,
    %c1_i32_22 = arith.constant 1 : i32
    %58 = arith.addi %0, %c1_i32_22 : i32
    %c8_i32_23 = arith.constant 8 : i32
    %59 = arith.muli %58, %c8_i32_23 : i32
    %c0_i32_24 = arith.constant 0 : i32
    %60 = arith.addi %59, %c0_i32_24 : i32
    %61 = arith.index_cast %60 : i32 to index
    %62 = memref.load %arg1[%61] : memref<64xi32, #tpu.memory_space<smem>>
    %63 = arith.index_cast %62 : i32 to index
    %c0_25 = arith.constant 0 : index
    %64 = vector.load %arg2[%63, %c0_25] : memref<56x128xf32, #tpu.memory_space<vmem>>, vector<1x128xf32>
    %c1 = arith.constant 1 : index
    %c0_26 = arith.constant 0 : index
    %65 = vector.load %arg9[%c1, %c0_26] : memref<72x128xf32, #tpu.memory_space<vmem>>, vector<1x128xf32>
    tpu.vector_store %arg9[%c1, %c0_26], %64 {strides = array<i32>} : memref<72x128xf32, #tpu.memory_space<vmem>>, vector<1x128xf32>,
    %c1_i32_27 = arith.constant 1 : i32
    %66 = arith.addi %59, %c1_i32_27 : i32
    %67 = arith.index_cast %66 : i32 to index
    %68 = memref.load %arg1[%67] : memref<64xi32, #tpu.memory_space<smem>>
    %69 = arith.index_cast %68 : i32 to index
    %c0_28 = arith.constant 0 : index
    %70 = vector.load %arg2[%69, %c0_28] : memref<56x128xf32, #tpu.memory_space<vmem>>, vector<1x128xf32>
    %c9 = arith.constant 9 : index
    %c0_29 = arith.constant 0 : index
    %71 = vector.load %arg9[%c9, %c0_29] : memref<72x128xf32, #tpu.memory_space<vmem>>, vector<1x128xf32>
    tpu.vector_store %arg9[%c9, %c0_29], %70 {strides = array<i32>} : memref<72x128xf32, #tpu.memory_space<vmem>>, vector<1x128xf32>,
    %c2_i32_30 = arith.constant 2 : i32
    %72 = arith.addi %59, %c2_i32_30 : i32
    %73 = arith.index_cast %72 : i32 to index
    %74 = memref.load %arg1[%73] : memref<64xi32, #tpu.memory_space<smem>>
    %75 = arith.index_cast %74 : i32 to index
    %c0_31 = arith.constant 0 : index
    %76 = vector.load %arg2[%75, %c0_31] : memref<56x128xf32, #tpu.memory_space<vmem>>, vector<1x128xf32>
    %c17 = arith.constant 17 : index
    %c0_32 = arith.constant 0 : index
    %77 = vector.load %arg9[%c17, %c0_32] : memref<72x128xf32, #tpu.memory_space<vmem>>, vector<1x128xf32>
    tpu.vector_store %arg9[%c17, %c0_32], %76 {strides = array<i32>} : memref<72x128xf32, #tpu.memory_space<vmem>>, vector<1x128xf32>,
    %c3_i32_33 = arith.constant 3 : i32
    %78 = arith.addi %59, %c3_i32_33 : i32
    %79 = arith.index_cast %78 : i32 to index
    %80 = memref.load %arg1[%79] : memref<64xi32, #tpu.memory_space<smem>>
    %81 = arith.index_cast %80 : i32 to index
    %c0_34 = arith.constant 0 : index
    %82 = vector.load %arg2[%81, %c0_34] : memref<56x128xf32, #tpu.memory_space<vmem>>, vector<1x128xf32>
    %c25 = arith.constant 25 : index
    %c0_35 = arith.constant 0 : index
    %83 = vector.load %arg9[%c25, %c0_35] : memref<72x128xf32, #tpu.memory_space<vmem>>, vector<1x128xf32>
    tpu.vector_store %arg9[%c25, %c0_35], %82 {strides = array<i32>} : memref<72x128xf32, #tpu.memory_space<vmem>>, vector<1x128xf32>,
    %c4_i32_36 = arith.constant 4 : i32
    %84 = arith.addi %59, %c4_i32_36 : i32
    %85 = arith.index_cast %84 : i32 to index
    %86 = memref.load %arg1[%85] : memref<64xi32, #tpu.memory_space<smem>>
    %87 = arith.index_cast %86 : i32 to index
    %c0_37 = arith.constant 0 : index
    %88 = vector.load %arg2[%87, %c0_37] : memref<56x128xf32, #tpu.memory_space<vmem>>, vector<1x128xf32>
    %c33 = arith.constant 33 : index
    %c0_38 = arith.constant 0 : index
    %89 = vector.load %arg9[%c33, %c0_38] : memref<72x128xf32, #tpu.memory_space<vmem>>, vector<1x128xf32>
    tpu.vector_store %arg9[%c33, %c0_38], %88 {strides = array<i32>} : memref<72x128xf32, #tpu.memory_space<vmem>>, vector<1x128xf32>,
    %c5_i32_39 = arith.constant 5 : i32
    %90 = arith.addi %59, %c5_i32_39 : i32
    %91 = arith.index_cast %90 : i32 to index
    %92 = memref.load %arg1[%91] : memref<64xi32, #tpu.memory_space<smem>>
    %93 = arith.index_cast %92 : i32 to index
    %c0_40 = arith.constant 0 : index
    %94 = vector.load %arg2[%93, %c0_40] : memref<56x128xf32, #tpu.memory_space<vmem>>, vector<1x128xf32>
    %c41 = arith.constant 41 : index
    %c0_41 = arith.constant 0 : index
    %95 = vector.load %arg9[%c41, %c0_41] : memref<72x128xf32, #tpu.memory_space<vmem>>, vector<1x128xf32>
    tpu.vector_store %arg9[%c41, %c0_41], %94 {strides = array<i32>} : memref<72x128xf32, #tpu.memory_space<vmem>>, vector<1x128xf32>,
    %c6_i32_42 = arith.constant 6 : i32
    %96 = arith.addi %59, %c6_i32_42 : i32
    %97 = arith.index_cast %96 : i32 to index
    %98 = memref.load %arg1[%97] : memref<64xi32, #tpu.memory_space<smem>>
    %99 = arith.index_cast %98 : i32 to index
    %c0_43 = arith.constant 0 : index
    %100 = vector.load %arg2[%99, %c0_43] : memref<56x128xf32, #tpu.memory_space<vmem>>, vector<1x128xf32>
    %c49 = arith.constant 49 : index
    %c0_44 = arith.constant 0 : index
    %101 = vector.load %arg9[%c49, %c0_44] : memref<72x128xf32, #tpu.memory_space<vmem>>, vector<1x128xf32>
    tpu.vector_store %arg9[%c49, %c0_44], %100 {strides = array<i32>} : memref<72x128xf32, #tpu.memory_space<vmem>>, vector<1x128xf32>,
    %c7_i32_45 = arith.constant 7 : i32
    %102 = arith.addi %59, %c7_i32_45 : i32
    %103 = arith.index_cast %102 : i32 to index
    %104 = memref.load %arg1[%103] : memref<64xi32, #tpu.memory_space<smem>>
    %105 = arith.index_cast %104 : i32 to index
    %c0_46 = arith.constant 0 : index
    %106 = vector.load %arg2[%105, %c0_46] : memref<56x128xf32, #tpu.memory_space<vmem>>, vector<1x128xf32>
    %c57 = arith.constant 57 : index
    %c0_47 = arith.constant 0 : index
    %107 = vector.load %arg9[%c57, %c0_47] : memref<72x128xf32, #tpu.memory_space<vmem>>, vector<1x128xf32>
    tpu.vector_store %arg9[%c57, %c0_47], %106 {strides = array<i32>} : memref<72x128xf32, #tpu.memory_space<vmem>>, vector<1x128xf32>,
    %c8_i32_48 = arith.constant 8 : i32
    %108 = arith.addi %59, %c8_i32_48 : i32
    %c1_i32_49 = arith.constant 1 : i32
    %109 = arith.subi %108, %c1_i32_49 : i32
    %110 = arith.index_cast %109 : i32 to index
    %111 = memref.load %arg1[%110] : memref<64xi32, #tpu.memory_space<smem>>
    %112 = arith.index_cast %111 : i32 to index
    %c0_50 = arith.constant 0 : index
    %113 = vector.load %arg3[%112, %c0_50] : memref<56x128xf32, #tpu.memory_space<vmem>>, vector<1x128xf32>
    %c65 = arith.constant 65 : index
    %c0_51 = arith.constant 0 : index
    %114 = vector.load %arg9[%c65, %c0_51] : memref<72x128xf32, #tpu.memory_space<vmem>>, vector<1x128xf32>
    tpu.vector_store %arg9[%c65, %c0_51], %113 {strides = array<i32>} : memref<72x128xf32, #tpu.memory_space<vmem>>, vector<1x128xf32>,
    %c2_i32_52 = arith.constant 2 : i32
    %115 = arith.addi %0, %c2_i32_52 : i32
    %c8_i32_53 = arith.constant 8 : i32
    %116 = arith.muli %115, %c8_i32_53 : i32
    %c0_i32_54 = arith.constant 0 : i32
    %117 = arith.addi %116, %c0_i32_54 : i32
    %118 = arith.index_cast %117 : i32 to index
    %119 = memref.load %arg1[%118] : memref<64xi32, #tpu.memory_space<smem>>
    %120 = arith.index_cast %119 : i32 to index
    %c0_55 = arith.constant 0 : index
    %121 = vector.load %arg2[%120, %c0_55] : memref<56x128xf32, #tpu.memory_space<vmem>>, vector<1x128xf32>
    %c2 = arith.constant 2 : index
    %c0_56 = arith.constant 0 : index
    %122 = vector.load %arg9[%c2, %c0_56] : memref<72x128xf32, #tpu.memory_space<vmem>>, vector<1x128xf32>
    tpu.vector_store %arg9[%c2, %c0_56], %121 {strides = array<i32>} : memref<72x128xf32, #tpu.memory_space<vmem>>, vector<1x128xf32>,
    %c1_i32_57 = arith.constant 1 : i32
    %123 = arith.addi %116, %c1_i32_57 : i32
    %124 = arith.index_cast %123 : i32 to index
    %125 = memref.load %arg1[%124] : memref<64xi32, #tpu.memory_space<smem>>
    %126 = arith.index_cast %125 : i32 to index
    %c0_58 = arith.constant 0 : index
    %127 = vector.load %arg2[%126, %c0_58] : memref<56x128xf32, #tpu.memory_space<vmem>>, vector<1x128xf32>
    %c10 = arith.constant 10 : index
    %c0_59 = arith.constant 0 : index
    %128 = vector.load %arg9[%c10, %c0_59] : memref<72x128xf32, #tpu.memory_space<vmem>>, vector<1x128xf32>
    tpu.vector_store %arg9[%c10, %c0_59], %127 {strides = array<i32>} : memref<72x128xf32, #tpu.memory_space<vmem>>, vector<1x128xf32>,
    %c2_i32_60 = arith.constant 2 : i32
    %129 = arith.addi %116, %c2_i32_60 : i32
    %130 = arith.index_cast %129 : i32 to index
    %131 = memref.load %arg1[%130] : memref<64xi32, #tpu.memory_space<smem>>
    %132 = arith.index_cast %131 : i32 to index
    %c0_61 = arith.constant 0 : index
    %133 = vector.load %arg2[%132, %c0_61] : memref<56x128xf32, #tpu.memory_space<vmem>>, vector<1x128xf32>
    %c18 = arith.constant 18 : index
    %c0_62 = arith.constant 0 : index
    %134 = vector.load %arg9[%c18, %c0_62] : memref<72x128xf32, #tpu.memory_space<vmem>>, vector<1x128xf32>
    tpu.vector_store %arg9[%c18, %c0_62], %133 {strides = array<i32>} : memref<72x128xf32, #tpu.memory_space<vmem>>, vector<1x128xf32>,
    %c3_i32_63 = arith.constant 3 : i32
    %135 = arith.addi %116, %c3_i32_63 : i32
    %136 = arith.index_cast %135 : i32 to index
    %137 = memref.load %arg1[%136] : memref<64xi32, #tpu.memory_space<smem>>
    %138 = arith.index_cast %137 : i32 to index
    %c0_64 = arith.constant 0 : index
    %139 = vector.load %arg2[%138, %c0_64] : memref<56x128xf32, #tpu.memory_space<vmem>>, vector<1x128xf32>
    %c26 = arith.constant 26 : index
    %c0_65 = arith.constant 0 : index
    %140 = vector.load %arg9[%c26, %c0_65] : memref<72x128xf32, #tpu.memory_space<vmem>>, vector<1x128xf32>
    tpu.vector_store %arg9[%c26, %c0_65], %139 {strides = array<i32>} : memref<72x128xf32, #tpu.memory_space<vmem>>, vector<1x128xf32>,
    %c4_i32_66 = arith.constant 4 : i32
    %141 = arith.addi %116, %c4_i32_66 : i32
    %142 = arith.index_cast %141 : i32 to index
    %143 = memref.load %arg1[%142] : memref<64xi32, #tpu.memory_space<smem>>
    %144 = arith.index_cast %143 : i32 to index
    %c0_67 = arith.constant 0 : index
    %145 = vector.load %arg2[%144, %c0_67] : memref<56x128xf32, #tpu.memory_space<vmem>>, vector<1x128xf32>
    %c34 = arith.constant 34 : index
    %c0_68 = arith.constant 0 : index
    %146 = vector.load %arg9[%c34, %c0_68] : memref<72x128xf32, #tpu.memory_space<vmem>>, vector<1x128xf32>
    tpu.vector_store %arg9[%c34, %c0_68], %145 {strides = array<i32>} : memref<72x128xf32, #tpu.memory_space<vmem>>, vector<1x128xf32>,
    %c5_i32_69 = arith.constant 5 : i32
    %147 = arith.addi %116, %c5_i32_69 : i32
    %148 = arith.index_cast %147 : i32 to index
    %149 = memref.load %arg1[%148] : memref<64xi32, #tpu.memory_space<smem>>
    %150 = arith.index_cast %149 : i32 to index
    %c0_70 = arith.constant 0 : index
    %151 = vector.load %arg2[%150, %c0_70] : memref<56x128xf32, #tpu.memory_space<vmem>>, vector<1x128xf32>
    %c42 = arith.constant 42 : index
    %c0_71 = arith.constant 0 : index
    %152 = vector.load %arg9[%c42, %c0_71] : memref<72x128xf32, #tpu.memory_space<vmem>>, vector<1x128xf32>
    tpu.vector_store %arg9[%c42, %c0_71], %151 {strides = array<i32>} : memref<72x128xf32, #tpu.memory_space<vmem>>, vector<1x128xf32>,
    %c6_i32_72 = arith.constant 6 : i32
    %153 = arith.addi %116, %c6_i32_72 : i32
    %154 = arith.index_cast %153 : i32 to index
    %155 = memref.load %arg1[%154] : memref<64xi32, #tpu.memory_space<smem>>
    %156 = arith.index_cast %155 : i32 to index
    %c0_73 = arith.constant 0 : index
    %157 = vector.load %arg2[%156, %c0_73] : memref<56x128xf32, #tpu.memory_space<vmem>>, vector<1x128xf32>
    %c50 = arith.constant 50 : index
    %c0_74 = arith.constant 0 : index
    %158 = vector.load %arg9[%c50, %c0_74] : memref<72x128xf32, #tpu.memory_space<vmem>>, vector<1x128xf32>
    tpu.vector_store %arg9[%c50, %c0_74], %157 {strides = array<i32>} : memref<72x128xf32, #tpu.memory_space<vmem>>, vector<1x128xf32>,
    %c7_i32_75 = arith.constant 7 : i32
    %159 = arith.addi %116, %c7_i32_75 : i32
    %160 = arith.index_cast %159 : i32 to index
    %161 = memref.load %arg1[%160] : memref<64xi32, #tpu.memory_space<smem>>
    %162 = arith.index_cast %161 : i32 to index
    %c0_76 = arith.constant 0 : index
    %163 = vector.load %arg2[%162, %c0_76] : memref<56x128xf32, #tpu.memory_space<vmem>>, vector<1x128xf32>
    %c58 = arith.constant 58 : index
    %c0_77 = arith.constant 0 : index
    %164 = vector.load %arg9[%c58, %c0_77] : memref<72x128xf32, #tpu.memory_space<vmem>>, vector<1x128xf32>
    tpu.vector_store %arg9[%c58, %c0_77], %163 {strides = array<i32>} : memref<72x128xf32, #tpu.memory_space<vmem>>, vector<1x128xf32>,
    %c8_i32_78 = arith.constant 8 : i32
    %165 = arith.addi %116, %c8_i32_78 : i32
    %c1_i32_79 = arith.constant 1 : i32
    %166 = arith.subi %165, %c1_i32_79 : i32
    %167 = arith.index_cast %166 : i32 to index
    %168 = memref.load %arg1[%167] : memref<64xi32, #tpu.memory_space<smem>>
    %169 = arith.index_cast %168 : i32 to index
    %c0_80 = arith.constant 0 : index
    %170 = vector.load %arg3[%169, %c0_80] : memref<56x128xf32, #tpu.memory_space<vmem>>, vector<1x128xf32>
    %c66 = arith.constant 66 : index
    %c0_81 = arith.constant 0 : index
    %171 = vector.load %arg9[%c66, %c0_81] : memref<72x128xf32, #tpu.memory_space<vmem>>, vector<1x128xf32>
    tpu.vector_store %arg9[%c66, %c0_81], %170 {strides = array<i32>} : memref<72x128xf32, #tpu.memory_space<vmem>>, vector<1x128xf32>,
    %c3_i32_82 = arith.constant 3 : i32
    %172 = arith.addi %0, %c3_i32_82 : i32
    %c8_i32_83 = arith.constant 8 : i32
    %173 = arith.muli %172, %c8_i32_83 : i32
    %c0_i32_84 = arith.constant 0 : i32
    %174 = arith.addi %173, %c0_i32_84 : i32
    %175 = arith.index_cast %174 : i32 to index
    %176 = memref.load %arg1[%175] : memref<64xi32, #tpu.memory_space<smem>>
    %177 = arith.index_cast %176 : i32 to index
    %c0_85 = arith.constant 0 : index
    %178 = vector.load %arg2[%177, %c0_85] : memref<56x128xf32, #tpu.memory_space<vmem>>, vector<1x128xf32>
    %c3 = arith.constant 3 : index
    %c0_86 = arith.constant 0 : index
    %179 = vector.load %arg9[%c3, %c0_86] : memref<72x128xf32, #tpu.memory_space<vmem>>, vector<1x128xf32>
    tpu.vector_store %arg9[%c3, %c0_86], %178 {strides = array<i32>} : memref<72x128xf32, #tpu.memory_space<vmem>>, vector<1x128xf32>,
    %c1_i32_87 = arith.constant 1 : i32
    %180 = arith.addi %173, %c1_i32_87 : i32
    %181 = arith.index_cast %180 : i32 to index
    %182 = memref.load %arg1[%181] : memref<64xi32, #tpu.memory_space<smem>>
    %183 = arith.index_cast %182 : i32 to index
    %c0_88 = arith.constant 0 : index
    %184 = vector.load %arg2[%183, %c0_88] : memref<56x128xf32, #tpu.memory_space<vmem>>, vector<1x128xf32>
    %c11 = arith.constant 11 : index
    %c0_89 = arith.constant 0 : index
    %185 = vector.load %arg9[%c11, %c0_89] : memref<72x128xf32, #tpu.memory_space<vmem>>, vector<1x128xf32>
    tpu.vector_store %arg9[%c11, %c0_89], %184 {strides = array<i32>} : memref<72x128xf32, #tpu.memory_space<vmem>>, vector<1x128xf32>,
    %c2_i32_90 = arith.constant 2 : i32
    %186 = arith.addi %173, %c2_i32_90 : i32
    %187 = arith.index_cast %186 : i32 to index
    %188 = memref.load %arg1[%187] : memref<64xi32, #tpu.memory_space<smem>>
    %189 = arith.index_cast %188 : i32 to index
    %c0_91 = arith.constant 0 : index
    %190 = vector.load %arg2[%189, %c0_91] : memref<56x128xf32, #tpu.memory_space<vmem>>, vector<1x128xf32>
    %c19 = arith.constant 19 : index
    %c0_92 = arith.constant 0 : index
    %191 = vector.load %arg9[%c19, %c0_92] : memref<72x128xf32, #tpu.memory_space<vmem>>, vector<1x128xf32>
    tpu.vector_store %arg9[%c19, %c0_92], %190 {strides = array<i32>} : memref<72x128xf32, #tpu.memory_space<vmem>>, vector<1x128xf32>,
    %c3_i32_93 = arith.constant 3 : i32
    %192 = arith.addi %173, %c3_i32_93 : i32
    %193 = arith.index_cast %192 : i32 to index
    %194 = memref.load %arg1[%193] : memref<64xi32, #tpu.memory_space<smem>>
    %195 = arith.index_cast %194 : i32 to index
    %c0_94 = arith.constant 0 : index
    %196 = vector.load %arg2[%195, %c0_94] : memref<56x128xf32, #tpu.memory_space<vmem>>, vector<1x128xf32>
    %c27 = arith.constant 27 : index
    %c0_95 = arith.constant 0 : index
    %197 = vector.load %arg9[%c27, %c0_95] : memref<72x128xf32, #tpu.memory_space<vmem>>, vector<1x128xf32>
    tpu.vector_store %arg9[%c27, %c0_95], %196 {strides = array<i32>} : memref<72x128xf32, #tpu.memory_space<vmem>>, vector<1x128xf32>,
    %c4_i32_96 = arith.constant 4 : i32
    %198 = arith.addi %173, %c4_i32_96 : i32
    %199 = arith.index_cast %198 : i32 to index
    %200 = memref.load %arg1[%199] : memref<64xi32, #tpu.memory_space<smem>>
    %201 = arith.index_cast %200 : i32 to index
    %c0_97 = arith.constant 0 : index
    %202 = vector.load %arg2[%201, %c0_97] : memref<56x128xf32, #tpu.memory_space<vmem>>, vector<1x128xf32>
    %c35 = arith.constant 35 : index
    %c0_98 = arith.constant 0 : index
    %203 = vector.load %arg9[%c35, %c0_98] : memref<72x128xf32, #tpu.memory_space<vmem>>, vector<1x128xf32>
    tpu.vector_store %arg9[%c35, %c0_98], %202 {strides = array<i32>} : memref<72x128xf32, #tpu.memory_space<vmem>>, vector<1x128xf32>,
    %c5_i32_99 = arith.constant 5 : i32
    %204 = arith.addi %173, %c5_i32_99 : i32
    %205 = arith.index_cast %204 : i32 to index
    %206 = memref.load %arg1[%205] : memref<64xi32, #tpu.memory_space<smem>>
    %207 = arith.index_cast %206 : i32 to index
    %c0_100 = arith.constant 0 : index
    %208 = vector.load %arg2[%207, %c0_100] : memref<56x128xf32, #tpu.memory_space<vmem>>, vector<1x128xf32>
    %c43 = arith.constant 43 : index
    %c0_101 = arith.constant 0 : index
    %209 = vector.load %arg9[%c43, %c0_101] : memref<72x128xf32, #tpu.memory_space<vmem>>, vector<1x128xf32>
    tpu.vector_store %arg9[%c43, %c0_101], %208 {strides = array<i32>} : memref<72x128xf32, #tpu.memory_space<vmem>>, vector<1x128xf32>,
    %c6_i32_102 = arith.constant 6 : i32
    %210 = arith.addi %173, %c6_i32_102 : i32
    %211 = arith.index_cast %210 : i32 to index
    %212 = memref.load %arg1[%211] : memref<64xi32, #tpu.memory_space<smem>>
    %213 = arith.index_cast %212 : i32 to index
    %c0_103 = arith.constant 0 : index
    %214 = vector.load %arg2[%213, %c0_103] : memref<56x128xf32, #tpu.memory_space<vmem>>, vector<1x128xf32>
    %c51 = arith.constant 51 : index
    %c0_104 = arith.constant 0 : index
    %215 = vector.load %arg9[%c51, %c0_104] : memref<72x128xf32, #tpu.memory_space<vmem>>, vector<1x128xf32>
    tpu.vector_store %arg9[%c51, %c0_104], %214 {strides = array<i32>} : memref<72x128xf32, #tpu.memory_space<vmem>>, vector<1x128xf32>,
    %c7_i32_105 = arith.constant 7 : i32
    %216 = arith.addi %173, %c7_i32_105 : i32
    %217 = arith.index_cast %216 : i32 to index
    %218 = memref.load %arg1[%217] : memref<64xi32, #tpu.memory_space<smem>>
    %219 = arith.index_cast %218 : i32 to index
    %c0_106 = arith.constant 0 : index
    %220 = vector.load %arg2[%219, %c0_106] : memref<56x128xf32, #tpu.memory_space<vmem>>, vector<1x128xf32>
    %c59 = arith.constant 59 : index
    %c0_107 = arith.constant 0 : index
    %221 = vector.load %arg9[%c59, %c0_107] : memref<72x128xf32, #tpu.memory_space<vmem>>, vector<1x128xf32>
    tpu.vector_store %arg9[%c59, %c0_107], %220 {strides = array<i32>} : memref<72x128xf32, #tpu.memory_space<vmem>>, vector<1x128xf32>,
    %c8_i32_108 = arith.constant 8 : i32
    %222 = arith.addi %173, %c8_i32_108 : i32
    %c1_i32_109 = arith.constant 1 : i32
    %223 = arith.subi %222, %c1_i32_109 : i32
    %224 = arith.index_cast %223 : i32 to index
    %225 = memref.load %arg1[%224] : memref<64xi32, #tpu.memory_space<smem>>
    %226 = arith.index_cast %225 : i32 to index
    %c0_110 = arith.constant 0 : index
    %227 = vector.load %arg3[%226, %c0_110] : memref<56x128xf32, #tpu.memory_space<vmem>>, vector<1x128xf32>
    %c67 = arith.constant 67 : index
    %c0_111 = arith.constant 0 : index
    %228 = vector.load %arg9[%c67, %c0_111] : memref<72x128xf32, #tpu.memory_space<vmem>>, vector<1x128xf32>
    tpu.vector_store %arg9[%c67, %c0_111], %227 {strides = array<i32>} : memref<72x128xf32, #tpu.memory_space<vmem>>, vector<1x128xf32>,
    %c4_i32_112 = arith.constant 4 : i32
    %229 = arith.addi %0, %c4_i32_112 : i32
    %c8_i32_113 = arith.constant 8 : i32
    %230 = arith.muli %229, %c8_i32_113 : i32
    %c0_i32_114 = arith.constant 0 : i32
    %231 = arith.addi %230, %c0_i32_114 : i32
    %232 = arith.index_cast %231 : i32 to index
    %233 = memref.load %arg1[%232] : memref<64xi32, #tpu.memory_space<smem>>
    %234 = arith.index_cast %233 : i32 to index
    %c0_115 = arith.constant 0 : index
    %235 = vector.load %arg2[%234, %c0_115] : memref<56x128xf32, #tpu.memory_space<vmem>>, vector<1x128xf32>
    %c4 = arith.constant 4 : index
    %c0_116 = arith.constant 0 : index
    %236 = vector.load %arg9[%c4, %c0_116] : memref<72x128xf32, #tpu.memory_space<vmem>>, vector<1x128xf32>
    tpu.vector_store %arg9[%c4, %c0_116], %235 {strides = array<i32>} : memref<72x128xf32, #tpu.memory_space<vmem>>, vector<1x128xf32>,
    %c1_i32_117 = arith.constant 1 : i32
    %237 = arith.addi %230, %c1_i32_117 : i32
    %238 = arith.index_cast %237 : i32 to index
    %239 = memref.load %arg1[%238] : memref<64xi32, #tpu.memory_space<smem>>
    %240 = arith.index_cast %239 : i32 to index
    %c0_118 = arith.constant 0 : index
    %241 = vector.load %arg2[%240, %c0_118] : memref<56x128xf32, #tpu.memory_space<vmem>>, vector<1x128xf32>
    %c12 = arith.constant 12 : index
    %c0_119 = arith.constant 0 : index
    %242 = vector.load %arg9[%c12, %c0_119] : memref<72x128xf32, #tpu.memory_space<vmem>>, vector<1x128xf32>
    tpu.vector_store %arg9[%c12, %c0_119], %241 {strides = array<i32>} : memref<72x128xf32, #tpu.memory_space<vmem>>, vector<1x128xf32>,
    %c2_i32_120 = arith.constant 2 : i32
    %243 = arith.addi %230, %c2_i32_120 : i32
    %244 = arith.index_cast %243 : i32 to index
    %245 = memref.load %arg1[%244] : memref<64xi32, #tpu.memory_space<smem>>
    %246 = arith.index_cast %245 : i32 to index
    %c0_121 = arith.constant 0 : index
    %247 = vector.load %arg2[%246, %c0_121] : memref<56x128xf32, #tpu.memory_space<vmem>>, vector<1x128xf32>
    %c20 = arith.constant 20 : index
    %c0_122 = arith.constant 0 : index
    %248 = vector.load %arg9[%c20, %c0_122] : memref<72x128xf32, #tpu.memory_space<vmem>>, vector<1x128xf32>
    tpu.vector_store %arg9[%c20, %c0_122], %247 {strides = array<i32>} : memref<72x128xf32, #tpu.memory_space<vmem>>, vector<1x128xf32>,
    %c3_i32_123 = arith.constant 3 : i32
    %249 = arith.addi %230, %c3_i32_123 : i32
    %250 = arith.index_cast %249 : i32 to index
    %251 = memref.load %arg1[%250] : memref<64xi32, #tpu.memory_space<smem>>
    %252 = arith.index_cast %251 : i32 to index
    %c0_124 = arith.constant 0 : index
    %253 = vector.load %arg2[%252, %c0_124] : memref<56x128xf32, #tpu.memory_space<vmem>>, vector<1x128xf32>
    %c28 = arith.constant 28 : index
    %c0_125 = arith.constant 0 : index
    %254 = vector.load %arg9[%c28, %c0_125] : memref<72x128xf32, #tpu.memory_space<vmem>>, vector<1x128xf32>
    tpu.vector_store %arg9[%c28, %c0_125], %253 {strides = array<i32>} : memref<72x128xf32, #tpu.memory_space<vmem>>, vector<1x128xf32>,
    %c4_i32_126 = arith.constant 4 : i32
    %255 = arith.addi %230, %c4_i32_126 : i32
    %256 = arith.index_cast %255 : i32 to index
    %257 = memref.load %arg1[%256] : memref<64xi32, #tpu.memory_space<smem>>
    %258 = arith.index_cast %257 : i32 to index
    %c0_127 = arith.constant 0 : index
    %259 = vector.load %arg2[%258, %c0_127] : memref<56x128xf32, #tpu.memory_space<vmem>>, vector<1x128xf32>
    %c36 = arith.constant 36 : index
    %c0_128 = arith.constant 0 : index
    %260 = vector.load %arg9[%c36, %c0_128] : memref<72x128xf32, #tpu.memory_space<vmem>>, vector<1x128xf32>
    tpu.vector_store %arg9[%c36, %c0_128], %259 {strides = array<i32>} : memref<72x128xf32, #tpu.memory_space<vmem>>, vector<1x128xf32>,
    %c5_i32_129 = arith.constant 5 : i32
    %261 = arith.addi %230, %c5_i32_129 : i32
    %262 = arith.index_cast %261 : i32 to index
    %263 = memref.load %arg1[%262] : memref<64xi32, #tpu.memory_space<smem>>
    %264 = arith.index_cast %263 : i32 to index
    %c0_130 = arith.constant 0 : index
    %265 = vector.load %arg2[%264, %c0_130] : memref<56x128xf32, #tpu.memory_space<vmem>>, vector<1x128xf32>
    %c44 = arith.constant 44 : index
    %c0_131 = arith.constant 0 : index
    %266 = vector.load %arg9[%c44, %c0_131] : memref<72x128xf32, #tpu.memory_space<vmem>>, vector<1x128xf32>
    tpu.vector_store %arg9[%c44, %c0_131], %265 {strides = array<i32>} : memref<72x128xf32, #tpu.memory_space<vmem>>, vector<1x128xf32>,
    %c6_i32_132 = arith.constant 6 : i32
    %267 = arith.addi %230, %c6_i32_132 : i32
    %268 = arith.index_cast %267 : i32 to index
    %269 = memref.load %arg1[%268] : memref<64xi32, #tpu.memory_space<smem>>
    %270 = arith.index_cast %269 : i32 to index
    %c0_133 = arith.constant 0 : index
    %271 = vector.load %arg2[%270, %c0_133] : memref<56x128xf32, #tpu.memory_space<vmem>>, vector<1x128xf32>
    %c52 = arith.constant 52 : index
    %c0_134 = arith.constant 0 : index
    %272 = vector.load %arg9[%c52, %c0_134] : memref<72x128xf32, #tpu.memory_space<vmem>>, vector<1x128xf32>
    tpu.vector_store %arg9[%c52, %c0_134], %271 {strides = array<i32>} : memref<72x128xf32, #tpu.memory_space<vmem>>, vector<1x128xf32>,
    %c7_i32_135 = arith.constant 7 : i32
    %273 = arith.addi %230, %c7_i32_135 : i32
    %274 = arith.index_cast %273 : i32 to index
    %275 = memref.load %arg1[%274] : memref<64xi32, #tpu.memory_space<smem>>
    %276 = arith.index_cast %275 : i32 to index
    %c0_136 = arith.constant 0 : index
    %277 = vector.load %arg2[%276, %c0_136] : memref<56x128xf32, #tpu.memory_space<vmem>>, vector<1x128xf32>
    %c60 = arith.constant 60 : index
    %c0_137 = arith.constant 0 : index
    %278 = vector.load %arg9[%c60, %c0_137] : memref<72x128xf32, #tpu.memory_space<vmem>>, vector<1x128xf32>
    tpu.vector_store %arg9[%c60, %c0_137], %277 {strides = array<i32>} : memref<72x128xf32, #tpu.memory_space<vmem>>, vector<1x128xf32>,
    %c8_i32_138 = arith.constant 8 : i32
    %279 = arith.addi %230, %c8_i32_138 : i32
    %c1_i32_139 = arith.constant 1 : i32
    %280 = arith.subi %279, %c1_i32_139 : i32
    %281 = arith.index_cast %280 : i32 to index
    %282 = memref.load %arg1[%281] : memref<64xi32, #tpu.memory_space<smem>>
    %283 = arith.index_cast %282 : i32 to index
    %c0_140 = arith.constant 0 : index
    %284 = vector.load %arg3[%283, %c0_140] : memref<56x128xf32, #tpu.memory_space<vmem>>, vector<1x128xf32>
    %c68 = arith.constant 68 : index
    %c0_141 = arith.constant 0 : index
    %285 = vector.load %arg9[%c68, %c0_141] : memref<72x128xf32, #tpu.memory_space<vmem>>, vector<1x128xf32>
    tpu.vector_store %arg9[%c68, %c0_141], %284 {strides = array<i32>} : memref<72x128xf32, #tpu.memory_space<vmem>>, vector<1x128xf32>,
    %c5_i32_142 = arith.constant 5 : i32
    %286 = arith.addi %0, %c5_i32_142 : i32
    %c8_i32_143 = arith.constant 8 : i32
    %287 = arith.muli %286, %c8_i32_143 : i32
    %c0_i32_144 = arith.constant 0 : i32
    %288 = arith.addi %287, %c0_i32_144 : i32
    %289 = arith.index_cast %288 : i32 to index
    %290 = memref.load %arg1[%289] : memref<64xi32, #tpu.memory_space<smem>>
    %291 = arith.index_cast %290 : i32 to index
    %c0_145 = arith.constant 0 : index
    %292 = vector.load %arg2[%291, %c0_145] : memref<56x128xf32, #tpu.memory_space<vmem>>, vector<1x128xf32>
    %c5 = arith.constant 5 : index
    %c0_146 = arith.constant 0 : index
    %293 = vector.load %arg9[%c5, %c0_146] : memref<72x128xf32, #tpu.memory_space<vmem>>, vector<1x128xf32>
    tpu.vector_store %arg9[%c5, %c0_146], %292 {strides = array<i32>} : memref<72x128xf32, #tpu.memory_space<vmem>>, vector<1x128xf32>,
    %c1_i32_147 = arith.constant 1 : i32
    %294 = arith.addi %287, %c1_i32_147 : i32
    %295 = arith.index_cast %294 : i32 to index
    %296 = memref.load %arg1[%295] : memref<64xi32, #tpu.memory_space<smem>>
    %297 = arith.index_cast %296 : i32 to index
    %c0_148 = arith.constant 0 : index
    %298 = vector.load %arg2[%297, %c0_148] : memref<56x128xf32, #tpu.memory_space<vmem>>, vector<1x128xf32>
    %c13 = arith.constant 13 : index
    %c0_149 = arith.constant 0 : index
    %299 = vector.load %arg9[%c13, %c0_149] : memref<72x128xf32, #tpu.memory_space<vmem>>, vector<1x128xf32>
    tpu.vector_store %arg9[%c13, %c0_149], %298 {strides = array<i32>} : memref<72x128xf32, #tpu.memory_space<vmem>>, vector<1x128xf32>,
    %c2_i32_150 = arith.constant 2 : i32
    %300 = arith.addi %287, %c2_i32_150 : i32
    %301 = arith.index_cast %300 : i32 to index
    %302 = memref.load %arg1[%301] : memref<64xi32, #tpu.memory_space<smem>>
    %303 = arith.index_cast %302 : i32 to index
    %c0_151 = arith.constant 0 : index
    %304 = vector.load %arg2[%303, %c0_151] : memref<56x128xf32, #tpu.memory_space<vmem>>, vector<1x128xf32>
    %c21 = arith.constant 21 : index
    %c0_152 = arith.constant 0 : index
    %305 = vector.load %arg9[%c21, %c0_152] : memref<72x128xf32, #tpu.memory_space<vmem>>, vector<1x128xf32>
    tpu.vector_store %arg9[%c21, %c0_152], %304 {strides = array<i32>} : memref<72x128xf32, #tpu.memory_space<vmem>>, vector<1x128xf32>,
    %c3_i32_153 = arith.constant 3 : i32
    %306 = arith.addi %287, %c3_i32_153 : i32
    %307 = arith.index_cast %306 : i32 to index
    %308 = memref.load %arg1[%307] : memref<64xi32, #tpu.memory_space<smem>>
    %309 = arith.index_cast %308 : i32 to index
    %c0_154 = arith.constant 0 : index
    %310 = vector.load %arg2[%309, %c0_154] : memref<56x128xf32, #tpu.memory_space<vmem>>, vector<1x128xf32>
    %c29 = arith.constant 29 : index
    %c0_155 = arith.constant 0 : index
    %311 = vector.load %arg9[%c29, %c0_155] : memref<72x128xf32, #tpu.memory_space<vmem>>, vector<1x128xf32>
    tpu.vector_store %arg9[%c29, %c0_155], %310 {strides = array<i32>} : memref<72x128xf32, #tpu.memory_space<vmem>>, vector<1x128xf32>,
    %c4_i32_156 = arith.constant 4 : i32
    %312 = arith.addi %287, %c4_i32_156 : i32
    %313 = arith.index_cast %312 : i32 to index
    %314 = memref.load %arg1[%313] : memref<64xi32, #tpu.memory_space<smem>>
    %315 = arith.index_cast %314 : i32 to index
    %c0_157 = arith.constant 0 : index
    %316 = vector.load %arg2[%315, %c0_157] : memref<56x128xf32, #tpu.memory_space<vmem>>, vector<1x128xf32>
    %c37 = arith.constant 37 : index
    %c0_158 = arith.constant 0 : index
    %317 = vector.load %arg9[%c37, %c0_158] : memref<72x128xf32, #tpu.memory_space<vmem>>, vector<1x128xf32>
    tpu.vector_store %arg9[%c37, %c0_158], %316 {strides = array<i32>} : memref<72x128xf32, #tpu.memory_space<vmem>>, vector<1x128xf32>,
    %c5_i32_159 = arith.constant 5 : i32
    %318 = arith.addi %287, %c5_i32_159 : i32
    %319 = arith.index_cast %318 : i32 to index
    %320 = memref.load %arg1[%319] : memref<64xi32, #tpu.memory_space<smem>>
    %321 = arith.index_cast %320 : i32 to index
    %c0_160 = arith.constant 0 : index
    %322 = vector.load %arg2[%321, %c0_160] : memref<56x128xf32, #tpu.memory_space<vmem>>, vector<1x128xf32>
    %c45 = arith.constant 45 : index
    %c0_161 = arith.constant 0 : index
    %323 = vector.load %arg9[%c45, %c0_161] : memref<72x128xf32, #tpu.memory_space<vmem>>, vector<1x128xf32>
    tpu.vector_store %arg9[%c45, %c0_161], %322 {strides = array<i32>} : memref<72x128xf32, #tpu.memory_space<vmem>>, vector<1x128xf32>,
    %c6_i32_162 = arith.constant 6 : i32
    %324 = arith.addi %287, %c6_i32_162 : i32
    %325 = arith.index_cast %324 : i32 to index
    %326 = memref.load %arg1[%325] : memref<64xi32, #tpu.memory_space<smem>>
    %327 = arith.index_cast %326 : i32 to index
    %c0_163 = arith.constant 0 : index
    %328 = vector.load %arg2[%327, %c0_163] : memref<56x128xf32, #tpu.memory_space<vmem>>, vector<1x128xf32>
    %c53 = arith.constant 53 : index
    %c0_164 = arith.constant 0 : index
    %329 = vector.load %arg9[%c53, %c0_164] : memref<72x128xf32, #tpu.memory_space<vmem>>, vector<1x128xf32>
    tpu.vector_store %arg9[%c53, %c0_164], %328 {strides = array<i32>} : memref<72x128xf32, #tpu.memory_space<vmem>>, vector<1x128xf32>,
    %c7_i32_165 = arith.constant 7 : i32
    %330 = arith.addi %287, %c7_i32_165 : i32
    %331 = arith.index_cast %330 : i32 to index
    %332 = memref.load %arg1[%331] : memref<64xi32, #tpu.memory_space<smem>>
    %333 = arith.index_cast %332 : i32 to index
    %c0_166 = arith.constant 0 : index
    %334 = vector.load %arg2[%333, %c0_166] : memref<56x128xf32, #tpu.memory_space<vmem>>, vector<1x128xf32>
    %c61 = arith.constant 61 : index
    %c0_167 = arith.constant 0 : index
    %335 = vector.load %arg9[%c61, %c0_167] : memref<72x128xf32, #tpu.memory_space<vmem>>, vector<1x128xf32>
    tpu.vector_store %arg9[%c61, %c0_167], %334 {strides = array<i32>} : memref<72x128xf32, #tpu.memory_space<vmem>>, vector<1x128xf32>,
    %c8_i32_168 = arith.constant 8 : i32
    %336 = arith.addi %287, %c8_i32_168 : i32
    %c1_i32_169 = arith.constant 1 : i32
    %337 = arith.subi %336, %c1_i32_169 : i32
    %338 = arith.index_cast %337 : i32 to index
    %339 = memref.load %arg1[%338] : memref<64xi32, #tpu.memory_space<smem>>
    %340 = arith.index_cast %339 : i32 to index
    %c0_170 = arith.constant 0 : index
    %341 = vector.load %arg3[%340, %c0_170] : memref<56x128xf32, #tpu.memory_space<vmem>>, vector<1x128xf32>
    %c69 = arith.constant 69 : index
    %c0_171 = arith.constant 0 : index
    %342 = vector.load %arg9[%c69, %c0_171] : memref<72x128xf32, #tpu.memory_space<vmem>>, vector<1x128xf32>
    tpu.vector_store %arg9[%c69, %c0_171], %341 {strides = array<i32>} : memref<72x128xf32, #tpu.memory_space<vmem>>, vector<1x128xf32>,
    %c6_i32_172 = arith.constant 6 : i32
    %343 = arith.addi %0, %c6_i32_172 : i32
    %c8_i32_173 = arith.constant 8 : i32
    %344 = arith.muli %343, %c8_i32_173 : i32
    %c0_i32_174 = arith.constant 0 : i32
    %345 = arith.addi %344, %c0_i32_174 : i32
    %346 = arith.index_cast %345 : i32 to index
    %347 = memref.load %arg1[%346] : memref<64xi32, #tpu.memory_space<smem>>
    %348 = arith.index_cast %347 : i32 to index
    %c0_175 = arith.constant 0 : index
    %349 = vector.load %arg2[%348, %c0_175] : memref<56x128xf32, #tpu.memory_space<vmem>>, vector<1x128xf32>
    %c6 = arith.constant 6 : index
    %c0_176 = arith.constant 0 : index
    %350 = vector.load %arg9[%c6, %c0_176] : memref<72x128xf32, #tpu.memory_space<vmem>>, vector<1x128xf32>
    tpu.vector_store %arg9[%c6, %c0_176], %349 {strides = array<i32>} : memref<72x128xf32, #tpu.memory_space<vmem>>, vector<1x128xf32>,
    %c1_i32_177 = arith.constant 1 : i32
    %351 = arith.addi %344, %c1_i32_177 : i32
    %352 = arith.index_cast %351 : i32 to index
    %353 = memref.load %arg1[%352] : memref<64xi32, #tpu.memory_space<smem>>
    %354 = arith.index_cast %353 : i32 to index
    %c0_178 = arith.constant 0 : index
    %355 = vector.load %arg2[%354, %c0_178] : memref<56x128xf32, #tpu.memory_space<vmem>>, vector<1x128xf32>
    %c14 = arith.constant 14 : index
    %c0_179 = arith.constant 0 : index
    %356 = vector.load %arg9[%c14, %c0_179] : memref<72x128xf32, #tpu.memory_space<vmem>>, vector<1x128xf32>
    tpu.vector_store %arg9[%c14, %c0_179], %355 {strides = array<i32>} : memref<72x128xf32, #tpu.memory_space<vmem>>, vector<1x128xf32>,
    %c2_i32_180 = arith.constant 2 : i32
    %357 = arith.addi %344, %c2_i32_180 : i32
    %358 = arith.index_cast %357 : i32 to index
    %359 = memref.load %arg1[%358] : memref<64xi32, #tpu.memory_space<smem>>
    %360 = arith.index_cast %359 : i32 to index
    %c0_181 = arith.constant 0 : index
    %361 = vector.load %arg2[%360, %c0_181] : memref<56x128xf32, #tpu.memory_space<vmem>>, vector<1x128xf32>
    %c22 = arith.constant 22 : index
    %c0_182 = arith.constant 0 : index
    %362 = vector.load %arg9[%c22, %c0_182] : memref<72x128xf32, #tpu.memory_space<vmem>>, vector<1x128xf32>
    tpu.vector_store %arg9[%c22, %c0_182], %361 {strides = array<i32>} : memref<72x128xf32, #tpu.memory_space<vmem>>, vector<1x128xf32>,
    %c3_i32_183 = arith.constant 3 : i32
    %363 = arith.addi %344, %c3_i32_183 : i32
    %364 = arith.index_cast %363 : i32 to index
    %365 = memref.load %arg1[%364] : memref<64xi32, #tpu.memory_space<smem>>
    %366 = arith.index_cast %365 : i32 to index
    %c0_184 = arith.constant 0 : index
    %367 = vector.load %arg2[%366, %c0_184] : memref<56x128xf32, #tpu.memory_space<vmem>>, vector<1x128xf32>
    %c30 = arith.constant 30 : index
    %c0_185 = arith.constant 0 : index
    %368 = vector.load %arg9[%c30, %c0_185] : memref<72x128xf32, #tpu.memory_space<vmem>>, vector<1x128xf32>
    tpu.vector_store %arg9[%c30, %c0_185], %367 {strides = array<i32>} : memref<72x128xf32, #tpu.memory_space<vmem>>, vector<1x128xf32>,
    %c4_i32_186 = arith.constant 4 : i32
    %369 = arith.addi %344, %c4_i32_186 : i32
    %370 = arith.index_cast %369 : i32 to index
    %371 = memref.load %arg1[%370] : memref<64xi32, #tpu.memory_space<smem>>
    %372 = arith.index_cast %371 : i32 to index
    %c0_187 = arith.constant 0 : index
    %373 = vector.load %arg2[%372, %c0_187] : memref<56x128xf32, #tpu.memory_space<vmem>>, vector<1x128xf32>
    %c38 = arith.constant 38 : index
    %c0_188 = arith.constant 0 : index
    %374 = vector.load %arg9[%c38, %c0_188] : memref<72x128xf32, #tpu.memory_space<vmem>>, vector<1x128xf32>
    tpu.vector_store %arg9[%c38, %c0_188], %373 {strides = array<i32>} : memref<72x128xf32, #tpu.memory_space<vmem>>, vector<1x128xf32>,
    %c5_i32_189 = arith.constant 5 : i32
    %375 = arith.addi %344, %c5_i32_189 : i32
    %376 = arith.index_cast %375 : i32 to index
    %377 = memref.load %arg1[%376] : memref<64xi32, #tpu.memory_space<smem>>
    %378 = arith.index_cast %377 : i32 to index
    %c0_190 = arith.constant 0 : index
    %379 = vector.load %arg2[%378, %c0_190] : memref<56x128xf32, #tpu.memory_space<vmem>>, vector<1x128xf32>
    %c46 = arith.constant 46 : index
    %c0_191 = arith.constant 0 : index
    %380 = vector.load %arg9[%c46, %c0_191] : memref<72x128xf32, #tpu.memory_space<vmem>>, vector<1x128xf32>
    tpu.vector_store %arg9[%c46, %c0_191], %379 {strides = array<i32>} : memref<72x128xf32, #tpu.memory_space<vmem>>, vector<1x128xf32>,
    %c6_i32_192 = arith.constant 6 : i32
    %381 = arith.addi %344, %c6_i32_192 : i32
    %382 = arith.index_cast %381 : i32 to index
    %383 = memref.load %arg1[%382] : memref<64xi32, #tpu.memory_space<smem>>
    %384 = arith.index_cast %383 : i32 to index
    %c0_193 = arith.constant 0 : index
    %385 = vector.load %arg2[%384, %c0_193] : memref<56x128xf32, #tpu.memory_space<vmem>>, vector<1x128xf32>
    %c54 = arith.constant 54 : index
    %c0_194 = arith.constant 0 : index
    %386 = vector.load %arg9[%c54, %c0_194] : memref<72x128xf32, #tpu.memory_space<vmem>>, vector<1x128xf32>
    tpu.vector_store %arg9[%c54, %c0_194], %385 {strides = array<i32>} : memref<72x128xf32, #tpu.memory_space<vmem>>, vector<1x128xf32>,
    %c7_i32_195 = arith.constant 7 : i32
    %387 = arith.addi %344, %c7_i32_195 : i32
    %388 = arith.index_cast %387 : i32 to index
    %389 = memref.load %arg1[%388] : memref<64xi32, #tpu.memory_space<smem>>
    %390 = arith.index_cast %389 : i32 to index
    %c0_196 = arith.constant 0 : index
    %391 = vector.load %arg2[%390, %c0_196] : memref<56x128xf32, #tpu.memory_space<vmem>>, vector<1x128xf32>
    %c62 = arith.constant 62 : index
    %c0_197 = arith.constant 0 : index
    %392 = vector.load %arg9[%c62, %c0_197] : memref<72x128xf32, #tpu.memory_space<vmem>>, vector<1x128xf32>
    tpu.vector_store %arg9[%c62, %c0_197], %391 {strides = array<i32>} : memref<72x128xf32, #tpu.memory_space<vmem>>, vector<1x128xf32>,
    %c8_i32_198 = arith.constant 8 : i32
    %393 = arith.addi %344, %c8_i32_198 : i32
    %c1_i32_199 = arith.constant 1 : i32
    %394 = arith.subi %393, %c1_i32_199 : i32
    %395 = arith.index_cast %394 : i32 to index
    %396 = memref.load %arg1[%395] : memref<64xi32, #tpu.memory_space<smem>>
    %397 = arith.index_cast %396 : i32 to index
    %c0_200 = arith.constant 0 : index
    %398 = vector.load %arg3[%397, %c0_200] : memref<56x128xf32, #tpu.memory_space<vmem>>, vector<1x128xf32>
    %c70 = arith.constant 70 : index
    %c0_201 = arith.constant 0 : index
    %399 = vector.load %arg9[%c70, %c0_201] : memref<72x128xf32, #tpu.memory_space<vmem>>, vector<1x128xf32>
    tpu.vector_store %arg9[%c70, %c0_201], %398 {strides = array<i32>} : memref<72x128xf32, #tpu.memory_space<vmem>>, vector<1x128xf32>,
    %c7_i32_202 = arith.constant 7 : i32
    %400 = arith.addi %0, %c7_i32_202 : i32
    %c8_i32_203 = arith.constant 8 : i32
    %401 = arith.muli %400, %c8_i32_203 : i32
    %c0_i32_204 = arith.constant 0 : i32
    %402 = arith.addi %401, %c0_i32_204 : i32
    %403 = arith.index_cast %402 : i32 to index
    %404 = memref.load %arg1[%403] : memref<64xi32, #tpu.memory_space<smem>>
    %405 = arith.index_cast %404 : i32 to index
    %c0_205 = arith.constant 0 : index
    %406 = vector.load %arg2[%405, %c0_205] : memref<56x128xf32, #tpu.memory_space<vmem>>, vector<1x128xf32>
    %c7 = arith.constant 7 : index
    %c0_206 = arith.constant 0 : index
    %407 = vector.load %arg9[%c7, %c0_206] : memref<72x128xf32, #tpu.memory_space<vmem>>, vector<1x128xf32>
    tpu.vector_store %arg9[%c7, %c0_206], %406 {strides = array<i32>} : memref<72x128xf32, #tpu.memory_space<vmem>>, vector<1x128xf32>,
    %c1_i32_207 = arith.constant 1 : i32
    %408 = arith.addi %401, %c1_i32_207 : i32
    %409 = arith.index_cast %408 : i32 to index
    %410 = memref.load %arg1[%409] : memref<64xi32, #tpu.memory_space<smem>>
    %411 = arith.index_cast %410 : i32 to index
    %c0_208 = arith.constant 0 : index
    %412 = vector.load %arg2[%411, %c0_208] : memref<56x128xf32, #tpu.memory_space<vmem>>, vector<1x128xf32>
    %c15 = arith.constant 15 : index
    %c0_209 = arith.constant 0 : index
    %413 = vector.load %arg9[%c15, %c0_209] : memref<72x128xf32, #tpu.memory_space<vmem>>, vector<1x128xf32>
    tpu.vector_store %arg9[%c15, %c0_209], %412 {strides = array<i32>} : memref<72x128xf32, #tpu.memory_space<vmem>>, vector<1x128xf32>,
    %c2_i32_210 = arith.constant 2 : i32
    %414 = arith.addi %401, %c2_i32_210 : i32
    %415 = arith.index_cast %414 : i32 to index
    %416 = memref.load %arg1[%415] : memref<64xi32, #tpu.memory_space<smem>>
    %417 = arith.index_cast %416 : i32 to index
    %c0_211 = arith.constant 0 : index
    %418 = vector.load %arg2[%417, %c0_211] : memref<56x128xf32, #tpu.memory_space<vmem>>, vector<1x128xf32>
    %c23 = arith.constant 23 : index
    %c0_212 = arith.constant 0 : index
    %419 = vector.load %arg9[%c23, %c0_212] : memref<72x128xf32, #tpu.memory_space<vmem>>, vector<1x128xf32>
    tpu.vector_store %arg9[%c23, %c0_212], %418 {strides = array<i32>} : memref<72x128xf32, #tpu.memory_space<vmem>>, vector<1x128xf32>,
    %c3_i32_213 = arith.constant 3 : i32
    %420 = arith.addi %401, %c3_i32_213 : i32
    %421 = arith.index_cast %420 : i32 to index
    %422 = memref.load %arg1[%421] : memref<64xi32, #tpu.memory_space<smem>>
    %423 = arith.index_cast %422 : i32 to index
    %c0_214 = arith.constant 0 : index
    %424 = vector.load %arg2[%423, %c0_214] : memref<56x128xf32, #tpu.memory_space<vmem>>, vector<1x128xf32>
    %c31 = arith.constant 31 : index
    %c0_215 = arith.constant 0 : index
    %425 = vector.load %arg9[%c31, %c0_215] : memref<72x128xf32, #tpu.memory_space<vmem>>, vector<1x128xf32>
    tpu.vector_store %arg9[%c31, %c0_215], %424 {strides = array<i32>} : memref<72x128xf32, #tpu.memory_space<vmem>>, vector<1x128xf32>,
    %c4_i32_216 = arith.constant 4 : i32
    %426 = arith.addi %401, %c4_i32_216 : i32
    %427 = arith.index_cast %426 : i32 to index
    %428 = memref.load %arg1[%427] : memref<64xi32, #tpu.memory_space<smem>>
    %429 = arith.index_cast %428 : i32 to index
    %c0_217 = arith.constant 0 : index
    %430 = vector.load %arg2[%429, %c0_217] : memref<56x128xf32, #tpu.memory_space<vmem>>, vector<1x128xf32>
    %c39 = arith.constant 39 : index
    %c0_218 = arith.constant 0 : index
    %431 = vector.load %arg9[%c39, %c0_218] : memref<72x128xf32, #tpu.memory_space<vmem>>, vector<1x128xf32>
    tpu.vector_store %arg9[%c39, %c0_218], %430 {strides = array<i32>} : memref<72x128xf32, #tpu.memory_space<vmem>>, vector<1x128xf32>,
    %c5_i32_219 = arith.constant 5 : i32
    %432 = arith.addi %401, %c5_i32_219 : i32
    %433 = arith.index_cast %432 : i32 to index
    %434 = memref.load %arg1[%433] : memref<64xi32, #tpu.memory_space<smem>>
    %435 = arith.index_cast %434 : i32 to index
    %c0_220 = arith.constant 0 : index
    %436 = vector.load %arg2[%435, %c0_220] : memref<56x128xf32, #tpu.memory_space<vmem>>, vector<1x128xf32>
    %c47 = arith.constant 47 : index
    %c0_221 = arith.constant 0 : index
    %437 = vector.load %arg9[%c47, %c0_221] : memref<72x128xf32, #tpu.memory_space<vmem>>, vector<1x128xf32>
    tpu.vector_store %arg9[%c47, %c0_221], %436 {strides = array<i32>} : memref<72x128xf32, #tpu.memory_space<vmem>>, vector<1x128xf32>,
    %c6_i32_222 = arith.constant 6 : i32
    %438 = arith.addi %401, %c6_i32_222 : i32
    %439 = arith.index_cast %438 : i32 to index
    %440 = memref.load %arg1[%439] : memref<64xi32, #tpu.memory_space<smem>>
    %441 = arith.index_cast %440 : i32 to index
    %c0_223 = arith.constant 0 : index
    %442 = vector.load %arg2[%441, %c0_223] : memref<56x128xf32, #tpu.memory_space<vmem>>, vector<1x128xf32>
    %c55 = arith.constant 55 : index
    %c0_224 = arith.constant 0 : index
    %443 = vector.load %arg9[%c55, %c0_224] : memref<72x128xf32, #tpu.memory_space<vmem>>, vector<1x128xf32>
    tpu.vector_store %arg9[%c55, %c0_224], %442 {strides = array<i32>} : memref<72x128xf32, #tpu.memory_space<vmem>>, vector<1x128xf32>,
    %c7_i32_225 = arith.constant 7 : i32
    %444 = arith.addi %401, %c7_i32_225 : i32
    %445 = arith.index_cast %444 : i32 to index
    %446 = memref.load %arg1[%445] : memref<64xi32, #tpu.memory_space<smem>>
    %447 = arith.index_cast %446 : i32 to index
    %c0_226 = arith.constant 0 : index
    %448 = vector.load %arg2[%447, %c0_226] : memref<56x128xf32, #tpu.memory_space<vmem>>, vector<1x128xf32>
    %c63 = arith.constant 63 : index
    %c0_227 = arith.constant 0 : index
    %449 = vector.load %arg9[%c63, %c0_227] : memref<72x128xf32, #tpu.memory_space<vmem>>, vector<1x128xf32>
    tpu.vector_store %arg9[%c63, %c0_227], %448 {strides = array<i32>} : memref<72x128xf32, #tpu.memory_space<vmem>>, vector<1x128xf32>,
    %c8_i32_228 = arith.constant 8 : i32
    %450 = arith.addi %401, %c8_i32_228 : i32
    %c1_i32_229 = arith.constant 1 : i32
    %451 = arith.subi %450, %c1_i32_229 : i32
    %452 = arith.index_cast %451 : i32 to index
    %453 = memref.load %arg1[%452] : memref<64xi32, #tpu.memory_space<smem>>
    %454 = arith.index_cast %453 : i32 to index
    %c0_230 = arith.constant 0 : index
    %455 = vector.load %arg3[%454, %c0_230] : memref<56x128xf32, #tpu.memory_space<vmem>>, vector<1x128xf32>
    %c71 = arith.constant 71 : index
    %c0_231 = arith.constant 0 : index
    %456 = vector.load %arg9[%c71, %c0_231] : memref<72x128xf32, #tpu.memory_space<vmem>>, vector<1x128xf32>
    tpu.vector_store %arg9[%c71, %c0_231], %455 {strides = array<i32>} : memref<72x128xf32, #tpu.memory_space<vmem>>, vector<1x128xf32>,
    %c0_232 = arith.constant 0 : index
    %c0_233 = arith.constant 0 : index
    %457 = vector.load %arg4[%c0_232, %c0_233] : memref<32x128xf32, #tpu.memory_space<vmem>>, vector<32x128xf32>
    %cst = arith.constant 0.000000e+00 : f32
    %458 = vector.broadcast %cst : f32 to vector<8x32xf32>
    %cst_234 = arith.constant 0.000000e+00 : f32
    %459 = vector.broadcast %cst_234 : f32 to vector<8x32xf32>
    %c0_235 = arith.constant 0 : index
    %c0_236 = arith.constant 0 : index
    %460 = vector.load %arg9[%c0_235, %c0_236] : memref<72x128xf32, #tpu.memory_space<vmem>>, vector<8x128xf32>
    %cst_237 = arith.constant dense<0.000000e+00> : vector<8x128xf32>
    %461 = tpu.matmul %458, %457, %cst_237 {dimension_numbers = #tpu.dot_dimension_numbers<[1], [0], [0], [1], [0, 0, 1, 1], [], []>} : vector<8x32xf32>, vector<32x128xf32>, vector<8x128xf32> -> vector<8x128xf32>
    %462 = arith.addf %460, %461 : vector<8x128xf32>
    %463 = arith.negf %462 : vector<8x128xf32>
    %464 = math.exp %463 : vector<8x128xf32>
    %cst_238 = arith.constant 1.000000e+00 : f32
    %465 = vector.broadcast %cst_238 : f32 to vector<8x128xf32>
    %466 = arith.addf %465, %464 : vector<8x128xf32>
    %467 = arith.divf %465, %466 : vector<8x128xf32>
    %468 = vector.extract_strided_slice %467 {offsets = [0, 0], sizes = [8, 32], strides = [1, 1]} : vector<8x128xf32> to vector<8x32xf32>
    %469 = vector.extract_strided_slice %467 {offsets = [0, 32], sizes = [8, 32], strides = [1, 1]} : vector<8x128xf32> to vector<8x32xf32>
    %470 = vector.extract_strided_slice %467 {offsets = [0, 96], sizes = [8, 32], strides = [1, 1]} : vector<8x128xf32> to vector<8x32xf32>
    %471 = vector.extract_strided_slice %462 {offsets = [0, 64], sizes = [8, 32], strides = [1, 1]} : vector<8x128xf32> to vector<8x32xf32>
    %472 = math.tanh %471 : vector<8x32xf32>
    %473 = arith.mulf %469, %459 : vector<8x32xf32>
    %474 = arith.mulf %468, %472 : vector<8x32xf32>
    %475 = arith.addf %473, %474 : vector<8x32xf32>
    %476 = math.tanh %475 : vector<8x32xf32>
    %477 = arith.mulf %470, %476 : vector<8x32xf32>
    %c8_239 = arith.constant 8 : index
    %c0_240 = arith.constant 0 : index
    %478 = vector.load %arg9[%c8_239, %c0_240] : memref<72x128xf32, #tpu.memory_space<vmem>>, vector<8x128xf32>
    %cst_241 = arith.constant dense<0.000000e+00> : vector<8x128xf32>
    %479 = tpu.matmul %477, %457, %cst_241 {dimension_numbers = #tpu.dot_dimension_numbers<[1], [0], [0], [1], [0, 0, 1, 1], [], []>} : vector<8x32xf32>, vector<32x128xf32>, vector<8x128xf32> -> vector<8x128xf32>
    %480 = arith.addf %478, %479 : vector<8x128xf32>
    %481 = arith.negf %480 : vector<8x128xf32>
    %482 = math.exp %481 : vector<8x128xf32>
    %cst_242 = arith.constant 1.000000e+00 : f32
    %483 = vector.broadcast %cst_242 : f32 to vector<8x128xf32>
    %484 = arith.addf %483, %482 : vector<8x128xf32>
    %485 = arith.divf %483, %484 : vector<8x128xf32>
    %486 = vector.extract_strided_slice %485 {offsets = [0, 0], sizes = [8, 32], strides = [1, 1]} : vector<8x128xf32> to vector<8x32xf32>
    %487 = vector.extract_strided_slice %485 {offsets = [0, 32], sizes = [8, 32], strides = [1, 1]} : vector<8x128xf32> to vector<8x32xf32>
    %488 = vector.extract_strided_slice %485 {offsets = [0, 96], sizes = [8, 32], strides = [1, 1]} : vector<8x128xf32> to vector<8x32xf32>
    %489 = vector.extract_strided_slice %480 {offsets = [0, 64], sizes = [8, 32], strides = [1, 1]} : vector<8x128xf32> to vector<8x32xf32>
    %490 = math.tanh %489 : vector<8x32xf32>
    %491 = arith.mulf %487, %475 : vector<8x32xf32>
    %492 = arith.mulf %486, %490 : vector<8x32xf32>
    %493 = arith.addf %491, %492 : vector<8x32xf32>
    %494 = math.tanh %493 : vector<8x32xf32>
    %495 = arith.mulf %488, %494 : vector<8x32xf32>
    %c16_243 = arith.constant 16 : index
    %c0_244 = arith.constant 0 : index
    %496 = vector.load %arg9[%c16_243, %c0_244] : memref<72x128xf32, #tpu.memory_space<vmem>>, vector<8x128xf32>
    %cst_245 = arith.constant dense<0.000000e+00> : vector<8x128xf32>
    %497 = tpu.matmul %495, %457, %cst_245 {dimension_numbers = #tpu.dot_dimension_numbers<[1], [0], [0], [1], [0, 0, 1, 1], [], []>} : vector<8x32xf32>, vector<32x128xf32>, vector<8x128xf32> -> vector<8x128xf32>
    %498 = arith.addf %496, %497 : vector<8x128xf32>
    %499 = arith.negf %498 : vector<8x128xf32>
    %500 = math.exp %499 : vector<8x128xf32>
    %cst_246 = arith.constant 1.000000e+00 : f32
    %501 = vector.broadcast %cst_246 : f32 to vector<8x128xf32>
    %502 = arith.addf %501, %500 : vector<8x128xf32>
    %503 = arith.divf %501, %502 : vector<8x128xf32>
    %504 = vector.extract_strided_slice %503 {offsets = [0, 0], sizes = [8, 32], strides = [1, 1]} : vector<8x128xf32> to vector<8x32xf32>
    %505 = vector.extract_strided_slice %503 {offsets = [0, 32], sizes = [8, 32], strides = [1, 1]} : vector<8x128xf32> to vector<8x32xf32>
    %506 = vector.extract_strided_slice %503 {offsets = [0, 96], sizes = [8, 32], strides = [1, 1]} : vector<8x128xf32> to vector<8x32xf32>
    %507 = vector.extract_strided_slice %498 {offsets = [0, 64], sizes = [8, 32], strides = [1, 1]} : vector<8x128xf32> to vector<8x32xf32>
    %508 = math.tanh %507 : vector<8x32xf32>
    %509 = arith.mulf %505, %493 : vector<8x32xf32>
    %510 = arith.mulf %504, %508 : vector<8x32xf32>
    %511 = arith.addf %509, %510 : vector<8x32xf32>
    %512 = math.tanh %511 : vector<8x32xf32>
    %513 = arith.mulf %506, %512 : vector<8x32xf32>
    %c24_247 = arith.constant 24 : index
    %c0_248 = arith.constant 0 : index
    %514 = vector.load %arg9[%c24_247, %c0_248] : memref<72x128xf32, #tpu.memory_space<vmem>>, vector<8x128xf32>
    %cst_249 = arith.constant dense<0.000000e+00> : vector<8x128xf32>
    %515 = tpu.matmul %513, %457, %cst_249 {dimension_numbers = #tpu.dot_dimension_numbers<[1], [0], [0], [1], [0, 0, 1, 1], [], []>} : vector<8x32xf32>, vector<32x128xf32>, vector<8x128xf32> -> vector<8x128xf32>
    %516 = arith.addf %514, %515 : vector<8x128xf32>
    %517 = arith.negf %516 : vector<8x128xf32>
    %518 = math.exp %517 : vector<8x128xf32>
    %cst_250 = arith.constant 1.000000e+00 : f32
    %519 = vector.broadcast %cst_250 : f32 to vector<8x128xf32>
    %520 = arith.addf %519, %518 : vector<8x128xf32>
    %521 = arith.divf %519, %520 : vector<8x128xf32>
    %522 = vector.extract_strided_slice %521 {offsets = [0, 0], sizes = [8, 32], strides = [1, 1]} : vector<8x128xf32> to vector<8x32xf32>
    %523 = vector.extract_strided_slice %521 {offsets = [0, 32], sizes = [8, 32], strides = [1, 1]} : vector<8x128xf32> to vector<8x32xf32>
    %524 = vector.extract_strided_slice %521 {offsets = [0, 96], sizes = [8, 32], strides = [1, 1]} : vector<8x128xf32> to vector<8x32xf32>
    %525 = vector.extract_strided_slice %516 {offsets = [0, 64], sizes = [8, 32], strides = [1, 1]} : vector<8x128xf32> to vector<8x32xf32>
    %526 = math.tanh %525 : vector<8x32xf32>
    %527 = arith.mulf %523, %511 : vector<8x32xf32>
    %528 = arith.mulf %522, %526 : vector<8x32xf32>
    %529 = arith.addf %527, %528 : vector<8x32xf32>
    %530 = math.tanh %529 : vector<8x32xf32>
    %531 = arith.mulf %524, %530 : vector<8x32xf32>
    %c32_251 = arith.constant 32 : index
    %c0_252 = arith.constant 0 : index
    %532 = vector.load %arg9[%c32_251, %c0_252] : memref<72x128xf32, #tpu.memory_space<vmem>>, vector<8x128xf32>
    %cst_253 = arith.constant dense<0.000000e+00> : vector<8x128xf32>
    %533 = tpu.matmul %531, %457, %cst_253 {dimension_numbers = #tpu.dot_dimension_numbers<[1], [0], [0], [1], [0, 0, 1, 1], [], []>} : vector<8x32xf32>, vector<32x128xf32>, vector<8x128xf32> -> vector<8x128xf32>
    %534 = arith.addf %532, %533 : vector<8x128xf32>
    %535 = arith.negf %534 : vector<8x128xf32>
    %536 = math.exp %535 : vector<8x128xf32>
    %cst_254 = arith.constant 1.000000e+00 : f32
    %537 = vector.broadcast %cst_254 : f32 to vector<8x128xf32>
    %538 = arith.addf %537, %536 : vector<8x128xf32>
    %539 = arith.divf %537, %538 : vector<8x128xf32>
    %540 = vector.extract_strided_slice %539 {offsets = [0, 0], sizes = [8, 32], strides = [1, 1]} : vector<8x128xf32> to vector<8x32xf32>
    %541 = vector.extract_strided_slice %539 {offsets = [0, 32], sizes = [8, 32], strides = [1, 1]} : vector<8x128xf32> to vector<8x32xf32>
    %542 = vector.extract_strided_slice %539 {offsets = [0, 96], sizes = [8, 32], strides = [1, 1]} : vector<8x128xf32> to vector<8x32xf32>
    %543 = vector.extract_strided_slice %534 {offsets = [0, 64], sizes = [8, 32], strides = [1, 1]} : vector<8x128xf32> to vector<8x32xf32>
    %544 = math.tanh %543 : vector<8x32xf32>
    %545 = arith.mulf %541, %529 : vector<8x32xf32>
    %546 = arith.mulf %540, %544 : vector<8x32xf32>
    %547 = arith.addf %545, %546 : vector<8x32xf32>
    %548 = math.tanh %547 : vector<8x32xf32>
    %549 = arith.mulf %542, %548 : vector<8x32xf32>
    %c40_255 = arith.constant 40 : index
    %c0_256 = arith.constant 0 : index
    %550 = vector.load %arg9[%c40_255, %c0_256] : memref<72x128xf32, #tpu.memory_space<vmem>>, vector<8x128xf32>
    %cst_257 = arith.constant dense<0.000000e+00> : vector<8x128xf32>
    %551 = tpu.matmul %549, %457, %cst_257 {dimension_numbers = #tpu.dot_dimension_numbers<[1], [0], [0], [1], [0, 0, 1, 1], [], []>} : vector<8x32xf32>, vector<32x128xf32>, vector<8x128xf32> -> vector<8x128xf32>
    %552 = arith.addf %550, %551 : vector<8x128xf32>
    %553 = arith.negf %552 : vector<8x128xf32>
    %554 = math.exp %553 : vector<8x128xf32>
    %cst_258 = arith.constant 1.000000e+00 : f32
    %555 = vector.broadcast %cst_258 : f32 to vector<8x128xf32>
    %556 = arith.addf %555, %554 : vector<8x128xf32>
    %557 = arith.divf %555, %556 : vector<8x128xf32>
    %558 = vector.extract_strided_slice %557 {offsets = [0, 0], sizes = [8, 32], strides = [1, 1]} : vector<8x128xf32> to vector<8x32xf32>
    %559 = vector.extract_strided_slice %557 {offsets = [0, 32], sizes = [8, 32], strides = [1, 1]} : vector<8x128xf32> to vector<8x32xf32>
    %560 = vector.extract_strided_slice %557 {offsets = [0, 96], sizes = [8, 32], strides = [1, 1]} : vector<8x128xf32> to vector<8x32xf32>
    %561 = vector.extract_strided_slice %552 {offsets = [0, 64], sizes = [8, 32], strides = [1, 1]} : vector<8x128xf32> to vector<8x32xf32>
    %562 = math.tanh %561 : vector<8x32xf32>
    %563 = arith.mulf %559, %547 : vector<8x32xf32>
    %564 = arith.mulf %558, %562 : vector<8x32xf32>
    %565 = arith.addf %563, %564 : vector<8x32xf32>
    %566 = math.tanh %565 : vector<8x32xf32>
    %567 = arith.mulf %560, %566 : vector<8x32xf32>
    %c48_259 = arith.constant 48 : index
    %c0_260 = arith.constant 0 : index
    %568 = vector.load %arg9[%c48_259, %c0_260] : memref<72x128xf32, #tpu.memory_space<vmem>>, vector<8x128xf32>
    %cst_261 = arith.constant dense<0.000000e+00> : vector<8x128xf32>
    %569 = tpu.matmul %567, %457, %cst_261 {dimension_numbers = #tpu.dot_dimension_numbers<[1], [0], [0], [1], [0, 0, 1, 1], [], []>} : vector<8x32xf32>, vector<32x128xf32>, vector<8x128xf32> -> vector<8x128xf32>
    %570 = arith.addf %568, %569 : vector<8x128xf32>
    %571 = arith.negf %570 : vector<8x128xf32>
    %572 = math.exp %571 : vector<8x128xf32>
    %cst_262 = arith.constant 1.000000e+00 : f32
    %573 = vector.broadcast %cst_262 : f32 to vector<8x128xf32>
    %574 = arith.addf %573, %572 : vector<8x128xf32>
    %575 = arith.divf %573, %574 : vector<8x128xf32>
    %576 = vector.extract_strided_slice %575 {offsets = [0, 0], sizes = [8, 32], strides = [1, 1]} : vector<8x128xf32> to vector<8x32xf32>
    %577 = vector.extract_strided_slice %575 {offsets = [0, 32], sizes = [8, 32], strides = [1, 1]} : vector<8x128xf32> to vector<8x32xf32>
    %578 = vector.extract_strided_slice %575 {offsets = [0, 96], sizes = [8, 32], strides = [1, 1]} : vector<8x128xf32> to vector<8x32xf32>
    %579 = vector.extract_strided_slice %570 {offsets = [0, 64], sizes = [8, 32], strides = [1, 1]} : vector<8x128xf32> to vector<8x32xf32>
    %580 = math.tanh %579 : vector<8x32xf32>
    %581 = arith.mulf %577, %565 : vector<8x32xf32>
    %582 = arith.mulf %576, %580 : vector<8x32xf32>
    %583 = arith.addf %581, %582 : vector<8x32xf32>
    %584 = math.tanh %583 : vector<8x32xf32>
    %585 = arith.mulf %578, %584 : vector<8x32xf32>
    %c56_263 = arith.constant 56 : index
    %c0_264 = arith.constant 0 : index
    %586 = vector.load %arg9[%c56_263, %c0_264] : memref<72x128xf32, #tpu.memory_space<vmem>>, vector<8x128xf32>
    %cst_265 = arith.constant dense<0.000000e+00> : vector<8x128xf32>
    %587 = tpu.matmul %585, %457, %cst_265 {dimension_numbers = #tpu.dot_dimension_numbers<[1], [0], [0], [1], [0, 0, 1, 1], [], []>} : vector<8x32xf32>, vector<32x128xf32>, vector<8x128xf32> -> vector<8x128xf32>
    %588 = arith.addf %586, %587 : vector<8x128xf32>
    %589 = arith.negf %588 : vector<8x128xf32>
    %590 = math.exp %589 : vector<8x128xf32>
    %cst_266 = arith.constant 1.000000e+00 : f32
    %591 = vector.broadcast %cst_266 : f32 to vector<8x128xf32>
    %592 = arith.addf %591, %590 : vector<8x128xf32>
    %593 = arith.divf %591, %592 : vector<8x128xf32>
    %594 = vector.extract_strided_slice %593 {offsets = [0, 0], sizes = [8, 32], strides = [1, 1]} : vector<8x128xf32> to vector<8x32xf32>
    %595 = vector.extract_strided_slice %593 {offsets = [0, 32], sizes = [8, 32], strides = [1, 1]} : vector<8x128xf32> to vector<8x32xf32>
    %596 = vector.extract_strided_slice %593 {offsets = [0, 96], sizes = [8, 32], strides = [1, 1]} : vector<8x128xf32> to vector<8x32xf32>
    %597 = vector.extract_strided_slice %588 {offsets = [0, 64], sizes = [8, 32], strides = [1, 1]} : vector<8x128xf32> to vector<8x32xf32>
    %598 = math.tanh %597 : vector<8x32xf32>
    %599 = arith.mulf %595, %583 : vector<8x32xf32>
    %600 = arith.mulf %594, %598 : vector<8x32xf32>
    %601 = arith.addf %599, %600 : vector<8x32xf32>
    %602 = math.tanh %601 : vector<8x32xf32>
    %603 = arith.mulf %596, %602 : vector<8x32xf32>
    %c64_267 = arith.constant 64 : index
    %c0_268 = arith.constant 0 : index
    %604 = vector.load %arg9[%c64_267, %c0_268] : memref<72x128xf32, #tpu.memory_space<vmem>>, vector<8x128xf32>
    %605 = vector.extract_strided_slice %604 {offsets = [0, 0], sizes = [8, 32], strides = [1, 1]} : vector<8x128xf32> to vector<8x32xf32>
    %606 = arith.negf %605 : vector<8x32xf32>
    %607 = math.exp %606 : vector<8x32xf32>
    %cst_269 = arith.constant 1.000000e+00 : f32
    %608 = vector.broadcast %cst_269 : f32 to vector<8x32xf32>
    %609 = arith.addf %608, %607 : vector<8x32xf32>
    %610 = arith.divf %608, %609 : vector<8x32xf32>
    %611 = vector.extract_strided_slice %604 {offsets = [0, 64], sizes = [8, 32], strides = [1, 1]} : vector<8x128xf32> to vector<8x32xf32>
    %612 = math.tanh %611 : vector<8x32xf32>
    %613 = vector.extract_strided_slice %604 {offsets = [0, 96], sizes = [8, 32], strides = [1, 1]} : vector<8x128xf32> to vector<8x32xf32>
    %614 = arith.negf %613 : vector<8x32xf32>
    %615 = math.exp %614 : vector<8x32xf32>
    %cst_270 = arith.constant 1.000000e+00 : f32
    %616 = vector.broadcast %cst_270 : f32 to vector<8x32xf32>
    %617 = arith.addf %616, %615 : vector<8x32xf32>
    %618 = arith.divf %616, %617 : vector<8x32xf32>
    %619 = arith.mulf %610, %612 : vector<8x32xf32>
    %620 = math.tanh %619 : vector<8x32xf32>
    %621 = arith.mulf %618, %620 : vector<8x32xf32>
    %c0_271 = arith.constant 0 : index
    %c0_272 = arith.constant 0 : index
    %622 = vector.load %arg5[%c0_271, %c0_272] : memref<32x128xf32, #tpu.memory_space<vmem>>, vector<32x128xf32>
    %cst_273 = arith.constant dense<0.000000e+00> : vector<8x128xf32>
    %623 = tpu.matmul %603, %622, %cst_273 {dimension_numbers = #tpu.dot_dimension_numbers<[1], [0], [0], [1], [0, 0, 1, 1], [], []>} : vector<8x32xf32>, vector<32x128xf32>, vector<8x128xf32> -> vector<8x128xf32>
    %c0_274 = arith.constant 0 : index
    %c0_275 = arith.constant 0 : index
    %624 = vector.load %arg6[%c0_274, %c0_275] : memref<32x128xf32, #tpu.memory_space<vmem>>, vector<32x128xf32>
    %cst_276 = arith.constant dense<0.000000e+00> : vector<8x128xf32>
    %625 = tpu.matmul %621, %624, %cst_276 {dimension_numbers = #tpu.dot_dimension_numbers<[1], [0], [0], [1], [0, 0, 1, 1], [], []>} : vector<8x32xf32>, vector<32x128xf32>, vector<8x128xf32> -> vector<8x128xf32>
    %626 = arith.addf %623, %625 : vector<8x128xf32>
    %c0_277 = arith.constant 0 : index
    %c0_278 = arith.constant 0 : index
    %627 = vector.load %arg7[%c0_277, %c0_278] : memref<1x128xf32, #tpu.memory_space<vmem>>, vector<1x128xf32>
    %628 = vector.broadcast %627 : vector<1x128xf32> to vector<8x128xf32>
    %629 = arith.addf %626, %628 : vector<8x128xf32>
    %c0_279 = arith.constant 0 : index
    %c0_280 = arith.constant 0 : index
    %630 = vector.load %arg8[%c0_279, %c0_280] : memref<8x128xf32, #tpu.memory_space<vmem>>, vector<8x128xf32>
    tpu.vector_store %arg8[%c0_279, %c0_280], %629 {strides = array<i32>} : memref<8x128xf32, #tpu.memory_space<vmem>>, vector<8x128xf32>,
    return
  }
  func.func @transform_0(%arg0: i32, %arg1: memref<64xi32, #tpu.memory_space<smem>>) -> (i32, i32) {
    %c0_i32 = arith.constant 0 : i32
    %c0_i32_0 = arith.constant 0 : i32
    %c0_i32_1 = arith.constant 0 : i32
    return %c0_i32, %c0_i32_0 : i32, i32
  }
  func.func @transform_1(%arg0: i32, %arg1: memref<64xi32, #tpu.memory_space<smem>>) -> (i32, i32) {
    %c0_i32 = arith.constant 0 : i32
    %c0_i32_0 = arith.constant 0 : i32
    %c0_i32_1 = arith.constant 0 : i32
    return %c0_i32, %c0_i32_0 : i32, i32
  }
  func.func @transform_2(%arg0: i32, %arg1: memref<64xi32, #tpu.memory_space<smem>>) -> (i32, i32) {
    %c0_i32 = arith.constant 0 : i32
    %c0_i32_0 = arith.constant 0 : i32
    %c0_i32_1 = arith.constant 0 : i32
    return %c0_i32, %c0_i32_0 : i32, i32
  }
  func.func @transform_3(%arg0: i32, %arg1: memref<64xi32, #tpu.memory_space<smem>>) -> (i32, i32) {
    %c0_i32 = arith.constant 0 : i32
    %c0_i32_0 = arith.constant 0 : i32
    %c0_i32_1 = arith.constant 0 : i32
    return %c0_i32, %c0_i32_0 : i32, i32
  }
  func.func @transform_4(%arg0: i32, %arg1: memref<64xi32, #tpu.memory_space<smem>>) -> (i32, i32) {
    %c0_i32 = arith.constant 0 : i32
    %c0_i32_0 = arith.constant 0 : i32
    %c0_i32_1 = arith.constant 0 : i32
    return %c0_i32, %c0_i32_0 : i32, i32
  }
  func.func @transform_5(%arg0: i32, %arg1: memref<64xi32, #tpu.memory_space<smem>>) -> (i32, i32) {
    %c0_i32 = arith.constant 0 : i32
    %c0_i32_0 = arith.constant 0 : i32
    %c0_i32_1 = arith.constant 0 : i32
    return %c0_i32, %c0_i32_0 : i32, i32
  }
  func.func @transform_6(%arg0: i32, %arg1: memref<64xi32, #tpu.memory_space<smem>>) -> (i32, i32) {
    %c0_i32 = arith.constant 0 : i32
    %c0_i32_0 = arith.constant 0 : i32
    return %arg0, %c0_i32 : i32, i32
  }
}

</mosaic_0001>

<bundles_post_ra>
// kernel: review_classifier_forward.1
= control target key start
LH: loop header
LB: loop body
LE: loop exit
PB: predicated region body
PF: predicated region fallthrough
CT: control target
= control target key end

     0   :  { %s2362_s0 = inlined_call_operand.vmem [shape: s32[64], index: 0, kind: input, shape index: {}]   ;;  %s2363_s1 = inlined_call_operand.hbm [shape: f32[56,128], index: 1, kind: input, shape index: {}]   ;;  %s2364_s2 = inlined_call_operand.hbm [shape: f32[56,128], index: 2, kind: input, shape index: {}]   ;;  %s2365_s3 = inlined_call_operand.hbm [shape: f32[32,128], index: 3, kind: input, shape index: {}]   ;;  %s2366_s4 = inlined_call_operand.hbm [shape: f32[32,128], index: 4, kind: input, shape index: {}]   ;;  %s2367_s5 = inlined_call_operand.hbm [shape: f32[32,128], index: 5, kind: input, shape index: {}]   ;;  %s2368_s6 = inlined_call_operand.vmem [shape: f32[1,128], index: 6, kind: input, shape index: {}]   ;;  %s2369_s7 = inlined_call_operand.vmem [shape: f32[8,128], index: 7, kind: output, shape index: {}]  }
   0x1   :  { %s12_s26 = sshll.u32 %s2362_s0, 4  ;;  %s13_s26 = int_to_ptr.vmem [resolvable:$true] %s12_s26 }
   0x2   :  { %s1930_s27 = scalar_lea.vmem %s13_s26, 16  ;;  %p1935_p1 = scmp.lt.s32.totalorder %s13_s26, %s13_s26 }
   0x3   :  { %p1931_p0 = scmp.ne.s32.totalorder %s13_s26, %s1930_s27  ;;  %p1936_p2 = scmp.lt.s32.totalorder %s1930_s27, %s1930_s27 }
   0x5   :  { %p1937_p3 = por %p1936_p2, %p1935_p1 }
   0x7   :  { %p1938_p4 = pnand %p1937_p3, %p1931_p0 }
   0x9   :  { %1941 = shalt.err (!%p1938_p4)  }
   0xa   :  { %s2060_s28 = smov [#allocation4]  }
   0xb   :  { %15 = dma.vmem_to_smem %s13_s26, 16, %s2060_s28, [#allocation3] }
   0xc   :  { %2052 = dma.done.wait [#allocation3], 16 }
   0xd   :  { %2053 = vsyncadd [#allocation3], 4294967280 }
   0xe   :  { %17 = sfence }
   0xf   :  { %18 = vsyncpa [#allocation6], 0 }
  0x10   :  { %19 = vsyncpa [#allocation8], 0 }
  0x11   :  { %20 = vsyncpa [#allocation11], 0  ;;  %s2061_s29 = smov [#allocation7]   ;;  %s2062_s8 = smov [#allocation10]  }
  0x12   :  { %s38_s30 = sshll.u32 %s2061_s29, 4  ;;  %s62_s0 = sshll.u32 %s2062_s8, 4  ;;  %s39_s30 = int_to_ptr.vmem [resolvable:$true] %s38_s30  ;;  %s2117_s0 = int_to_ptr.vmem [resolvable:$true] %s62_s0 }
  0x13   :  { %s1942_s11 = scalar_lea.hbm %s2364_s2, 896 }
  0x14   :  { %p1943_p5 = scmp.ne.s32.totalorder %s2364_s2, %s1942_s11  ;;  %p1946_p6 = scmp.lt.u32.totalorder %s1942_s11, %s2364_s2 }
  0x16   :  { %p1948_p7 = pnand %p1946_p6, %p1943_p5 }
  0x18   :  { %1951 = shalt.err (!%p1948_p7)
}
  0x19   :  { %s1952_s16 = scalar_lea.vmem %s39_s30, 896  ;;  %p1957_p9 = scmp.lt.s32.totalorder %s39_s30, %s39_s30 }
  0x1a   :  { %p1953_p8 = scmp.ne.s32.totalorder %s39_s30, %s1952_s16  ;;  %p1958_p10 = scmp.lt.s32.totalorder %s1952_s16, %s1952_s16 }
  0x1c   :  { %p1959_p11 = por %p1958_p10, %p1957_p9 }
  0x1e   :  { %p1960_p12 = pnand %p1959_p11, %p1953_p8 }
  0x20   :  { %1963 = shalt.err (!%p1960_p12)
}
  0x21   :  { %s2063_s17 = smov 128   ;;  %s2064_s18 = smov 8  }
  0x22   :  { %44 = dma.hbm_to_vmem [thread:$0]  %s2364_s2, 896, %s39_s30, [#allocation8], %s2063_s17, %s2063_s17, %s2064_s18  }
  0x23   :  { %s1964_s23 = scalar_lea.hbm %s2366_s4, 512 }
  0x24   :  { %p1965_p13 = scmp.ne.s32.totalorder %s2366_s4, %s1964_s23  ;;  %p1968_p0 = scmp.lt.u32.totalorder %s1964_s23, %s2366_s4 }
  0x26   :  { %p1970_p1 = pnand %p1968_p0, %p1965_p13 }
  0x28   :  { %1973 = shalt.err (!%p1970_p1)
}
  0x29   :  { %s1974_s28 = scalar_lea.vmem %s2117_s0, 512  ;;  %p1979_p3 = scmp.lt.s32.totalorder %s2117_s0, %s2117_s0 }
  0x2a   :  { %p1975_p2 = scmp.ne.s32.totalorder %s2117_s0, %s1974_s28  ;;  %p1980_p4 = scmp.lt.s32.totalorder %s1974_s28, %s1974_s28 }
  0x2c   :  { %p1981_p5 = por %p1980_p4, %p1979_p3 }
  0x2e   :  { %p1982_p6 = pnand %p1981_p5, %p1975_p2 }
  0x30   :  { %1985 = shalt.err (!%p1982_p6)
}
  0x31   :  { %68 = dma.hbm_to_vmem [thread:$0]  %s2366_s4, 512, %s2117_s0, [#allocation11], %s2063_s17, %s2063_s17, %s2064_s18  }
  0x32   :  { %s2065_s30 = smov [#allocation5]   ;;  %s2066_s9 = smov [#allocation9]  }
  0x33   :  { %s26_s8 = sshll.u32 %s2065_s30, 4  ;;  %s50_s10 = sshll.u32 %s2066_s9, 4  ;;  %s27_s8 = int_to_ptr.vmem [resolvable:$true] %s26_s8  ;;  %s2154_s10 = int_to_ptr.vmem [resolvable:$true] %s50_s10 }
  0x34   :  { %s1986_s13 = scalar_lea.hbm %s2363_s1, 896 }
  0x35   :  { %p1987_p7 = scmp.ne.s32.totalorder %s2363_s1, %s1986_s13  ;;  %p1990_p8 = scmp.lt.u32.totalorder %s1986_s13, %s2363_s1 }
  0x37   :  { %p1992_p9 = pnand %p1990_p8, %p1987_p7 }
  0x39   :  { %1995 = shalt.err (!%p1992_p9)
}
  0x3a   :  { %s1996_s4 = scalar_lea.vmem %s27_s8, 896  ;;  %p2001_p11 = scmp.lt.s32.totalorder %s27_s8, %s27_s8 }
  0x3b   :  { %p1997_p10 = scmp.ne.s32.totalorder %s27_s8, %s1996_s4  ;;  %p2002_p12 = scmp.lt.s32.totalorder %s1996_s4, %s1996_s4 }
  0x3d   :  { %p2003_p13 = por %p2002_p12, %p2001_p11 }
  0x3f   :  { %p2004_p0 = pnand %p2003_p13, %p1997_p10 }
  0x41   :  { %2007 = shalt.err (!%p2004_p0)
}
  0x42   :  { %32 = dma.hbm_to_vmem [thread:$0]  %s2363_s1, 896, %s27_s8, [#allocation6], %s2063_s17, %s2063_s17, %s2064_s18  }
  0x43   :  { %s2008_s23 = scalar_lea.hbm %s2365_s3, 512 }
  0x44   :  { %p2009_p1 = scmp.ne.s32.totalorder %s2365_s3, %s2008_s23  ;;  %p2012_p2 = scmp.lt.u32.totalorder %s2008_s23, %s2365_s3 }
  0x46   :  { %p2014_p3 = pnand %p2012_p2, %p2009_p1 }
  0x48   :  { %2017 = shalt.err (!%p2014_p3)
}
  0x49   :  { %s2018_s28 = scalar_lea.vmem %s2154_s10, 512  ;;  %p2023_p5 = scmp.lt.s32.totalorder %s2154_s10, %s2154_s10 }
  0x4a   :  { %p2019_p4 = scmp.ne.s32.totalorder %s2154_s10, %s2018_s28  ;;  %p2024_p6 = scmp.lt.s32.totalorder %s2018_s28, %s2018_s28 }
  0x4c   :  { %p2025_p7 = por %p2024_p6, %p2023_p5 }
  0x4e   :  { %p2026_p8 = pnand %p2025_p7, %p2019_p4 }
  0x50   :  { %2029 = shalt.err (!%p2026_p8)
}
  0x51   :  { %56 = dma.hbm_to_vmem [thread:$0]  %s2365_s3, 512, %s2154_s10, [#allocation8], %s2063_s17, %s2063_s17, %s2064_s18  }
  0x52   :  { %s2067_s29 = smov [#allocation12]   ;;  %s2030_s11 = scalar_lea.hbm %s2367_s5, 512 }
  0x53   :  { %s74_s30 = sshll.u32 %s2067_s29, 4  ;;  %p2031_p9 = scmp.ne.s32.totalorder %s2367_s5, %s2030_s11  ;;  %s75_s30 = int_to_ptr.vmem [resolvable:$true] %s74_s30 }
  0x54   :  { %p2034_p10 = scmp.lt.u32.totalorder %s2030_s11, %s2367_s5 }
  0x56   :  { %p2036_p11 = pnand %p2034_p10, %p2031_p9 }
  0x58   :  { %2039 = shalt.err (!%p2036_p11)
}
  0x59   :  { %s2040_s16 = scalar_lea.vmem %s75_s30, 512  ;;  %p2045_p13 = scmp.lt.s32.totalorder %s75_s30, %s75_s30 }
  0x5a   :  { %p2041_p12 = scmp.ne.s32.totalorder %s75_s30, %s2040_s16  ;;  %p2046_p0 = scmp.lt.s32.totalorder %s2040_s16, %s2040_s16 }
  0x5c   :  { %p2047_p1 = por %p2046_p0, %p2045_p13 }
  0x5e   :  { %p2048_p2 = pnand %p2047_p1, %p2041_p12 }
  0x60   :  { %2051 = shalt.err (!%p2048_p2)
}
  0x61   :  { %80 = dma.hbm_to_vmem [thread:$0]  %s2367_s5, 512, %s75_s30, [#allocation11], %s2063_s17, %s2063_s17, %s2064_s18  }
  0x62   :  { %2054 = dma.done.wait [#allocation6], 896  }
  0x63   :  { %2055 = vsyncadd [#allocation6], 4294966400 }
  0x64   :  { %2056 = dma.done.wait [#allocation8], 1408  }
  0x65   :  { %2057 = vsyncadd [#allocation8], 4294965888 }
  0x66   :  { %2058 = dma.done.wait [#allocation11], 1024  }
  0x67   :  { %2059 = vsyncadd [#allocation11], 4294966272  ;;  %v2068_v0 = vmov 0.0|0.0   ;;  %vm2069_vm0 = vmmov 0   ;;  %v2070_v1 = vmov 0.0   ;;  %s100_s19 = sld [smem:[#allocation4]] }
  0x68   :  { %1784 = vmatprep.subr.bf16.mxu0 %v2068_v0  ;;  %1682 = vmatprep.mubr.msk.f32.mxu0 %vm2069_vm0, %v2070_v1  ;;  %s1542_s4 = sld [smem:[#allocation4 + $0x8]]  ;;  %v458_v2 = vld [vmem:[#allocation9] sm:$0xff]  ;;  %v459_v3 = vld [vmem:[#allocation9 + $0x8] sm:$0xff]  ;;  %v460_v4 = vld [vmem:[#allocation9 + $0x10] sm:$0xff]  ;;  %s2071_s2 = smov 64   ;;  %vm463_vm1 = vcmask 261120  }
  0x69   :  { %s1551_s0 = sld [smem:[#allocation4 + $0x10]]  ;;  %1790 = vmatprep.subr.bf16.mxu1 %v2068_v0  ;;  %1693 = vmatprep.mubr.msk.f32.mxu1 %vm2069_vm0, %v2070_v1  ;;  %v2216_v5 = vpack.c.bf16 %v459_v3, %v458_v2  ;;  %v461_v6 = vld [vmem:[#allocation9 + $0x18] sm:$0xff]  ;;  %s2072_s29 = smov 32  }
  0x6a   :  { %s1560_s20 = sld [smem:[#allocation4 + $0x18]]  ;;  %v2219_v10 = vpack.c.bf16 %v461_v6, %v460_v4  ;;  %s1534_s30 = sld [smem:[#allocation4 + $0x1]] }
  0x6b   :  { %s1569_s5 = sld [smem:[#allocation4 + $0x20]]  ;;  %1786 = vmatpush3.bf16.msra.mxu0 %v2216_v5  ;;  %1792 = vmatpush3.bf16.msra.mxu1 %v2216_v5  ;;  %s1543_s8 = sld [smem:[#allocation4 + $0x9]] }
  0x6c   :  { %s1578_s17 = sld [smem:[#allocation4 + $0x28]]  ;;  %1787 = vmatprep.subr.bf16.mxu0 %v2068_v0  ;;  %1793 = vmatprep.subr.bf16.mxu1 %v2068_v0  ;;  %s1552_s9 = sld [smem:[#allocation4 + $0x11]] }
  0x6d   :  { %s2212_s18 = sld [smem:[#allocation4 + $0x30]]  ;;  %s101_s22 = scalar_lea.vmem [#allocation5], %s100_s19 }
  0x6e   :  { %s2214_s21 = sld [smem:[#allocation4 + $0x38]]  ;;  %v102_v7 = vld [vmem:[%s101_s22] sm:$0x1]  ;;  %s146_s23 = scalar_lea.vmem [#allocation5], %s1542_s4 }
  0x6f   :  { %v147_v8 = vld [vmem:[%s146_s23] sm:$0x1]  ;;  %103 = vst [vmem:[#allocation2] sm:$0x1] %v102_v7  ;;  %s191_s24 = scalar_lea.vmem [#allocation5], %s1551_s0  ;;  %1789 = vmatpush3.bf16.msra.mxu0 %v2219_v10  ;;  %1795 = vmatpush3.bf16.msra.mxu1 %v2219_v10  ;;  %s1561_s11 = sld [smem:[#allocation4 + $0x19]] }
  0x70   :  { %148 = vst [vmem:[#allocation2 + $0x1] sm:$0x1] %v147_v8  ;;  %v192_v9 = vld [vmem:[%s191_s24] sm:$0x1]  ;;  %s236_s25 = scalar_lea.vmem [#allocation5], %s1560_s20  ;;  %1796 = vmatprep.subr.bf16.mxu0 %v2068_v0  ;;  %1802 = vmatprep.subr.bf16.mxu1 %v2068_v0  ;;  %s1570_s12 = sld [smem:[#allocation4 + $0x21]] }
  0x71   :  { %193 = vst [vmem:[#allocation2 + $0x2] sm:$0x1] %v192_v9  ;;  %v237_v11 = vld [vmem:[%s236_s25] sm:$0x1]  ;;  %s281_s26 = scalar_lea.vmem [#allocation5], %s1569_s5  ;;  %s1579_s13 = sld [smem:[#allocation4 + $0x29]] }
  0x72   :  { %v282_v12 = vld [vmem:[%s281_s26] sm:$0x1]  ;;  %238 = vst [vmem:[#allocation2 + $0x3] sm:$0x1] %v237_v11  ;;  %s326_s27 = scalar_lea.vmem [#allocation5], %s1578_s17  ;;  %1683 = vmatmul.mubr.f32.vlgmr.msra.gmra.mrb[0].mxu0 %v2070_v1  ;;  %s1588_s14 = sld [smem:[#allocation4 + $0x31]] }
  0x73   :  { %283 = vst [vmem:[#allocation2 + $0x4] sm:$0x1] %v282_v12  ;;  %v327_v13 = vld [vmem:[%s326_s27] sm:$0x1]  ;;  %s371_s28 = scalar_lea.vmem [#allocation5], %s2212_s18  ;;  %1798 = vmatpush3.bf16.msra.mxu0 %v2216_v5  ;;  %1704 = vmatprep.mubr.msk.f32.mxu0 %vm2069_vm0, %v2070_v1  ;;  %s1597_s15 = sld [smem:[#allocation4 + $0x39]] }
  0x74   :  { %v372_v14 = vld [vmem:[%s371_s28] sm:$0x1]  ;;  %328 = vst [vmem:[#allocation2 + $0x5] sm:$0x1] %v327_v13  ;;  %s416_s1 = scalar_lea.vmem [#allocation5], %s2214_s21  ;;  %1799 = vmatprep.subr.bf16.mxu0 %v2068_v0  ;;  %s106_s16 = scalar_lea.vmem [#allocation5], %s1534_s30 }
  0x75   :  { %373 = vst [vmem:[#allocation2 + $0x6] sm:$0x1] %v372_v14  ;;  %v417_v15 = vld [vmem:[%s416_s1] sm:$0x1]  ;;  %s151_s3 = scalar_lea.vmem [#allocation5], %s1543_s8  ;;  %s196_s10 = scalar_lea.vmem [#allocation5], %s1552_s9 }
  0x76   :  { %418 = vst [vmem:[#allocation2 + $0x7] sm:$0x1] %v417_v15  ;;  %v107_v31 = vld [vmem:[%s106_s16] sm:$0x1]  ;;  %s241_s19 = scalar_lea.vmem [#allocation5], %s1561_s11  ;;  %s286_s4 = scalar_lea.vmem [#allocation5], %s1570_s12 }
  0x77   :  { %1801 = vmatpush3.bf16.msra.mxu0 %v2219_v10  ;;  %v152_v32 = vld [vmem:[%s151_s3] sm:$0x1]  ;;  %108 = vst [vmem:[#allocation2 + $0x8] sm:$0x1] %v107_v31  ;;  %s331_s0 = scalar_lea.vmem [#allocation5], %s1579_s13  ;;  %s1535_s17 = sld [smem:[#allocation4 + $0x2]] }
  0x78   :  { %1808 = vmatprep.subr.bf16.mxu0 %v2068_v0  ;;  %153 = vst [vmem:[#allocation2 + $0x9] sm:$0x1] %v152_v32  ;;  %v197_v33 = vld [vmem:[%s196_s10] sm:$0x1]  ;;  %s376_s20 = scalar_lea.vmem [#allocation5], %s1588_s14  ;;  %s1544_s18 = sld [smem:[#allocation4 + $0xa]] }
  0x79   :  { %v242_v34 = vld [vmem:[%s241_s19] sm:$0x1]  ;;  %198 = vst [vmem:[#allocation2 + $0xa] sm:$0x1] %v197_v33  ;;  %s421_s5 = scalar_lea.vmem [#allocation5], %s1597_s15  ;;  %s1553_s21 = sld [smem:[#allocation4 + $0x12]] }
  0x7a   :  { %243 = vst [vmem:[#allocation2 + $0xb] sm:$0x1] %v242_v34  ;;  %v287_v35 = vld [vmem:[%s286_s4] sm:$0x1]  ;;  %s1562_s22 = sld [smem:[#allocation4 + $0x1a]]  ;;  %s1536_s13 = sld [smem:[#allocation4 + $0x3]] }
  0x7b   :  { %v332_v36 = vld [vmem:[%s331_s0] sm:$0x1]  ;;  %288 = vst [vmem:[#allocation2 + $0xc] sm:$0x1] %v287_v35  ;;  %s1571_s23 = sld [smem:[#allocation4 + $0x22]]  ;;  %s1545_s14 = sld [smem:[#allocation4 + $0xb]] }
  0x7c   :  { %333 = vst [vmem:[#allocation2 + $0xd] sm:$0x1] %v332_v36  ;;  %v377_v38 = vld [vmem:[%s376_s20] sm:$0x1]  ;;  %s1580_s24 = sld [smem:[#allocation4 + $0x2a]]  ;;  %s1554_s15 = sld [smem:[#allocation4 + $0x13]] }
  0x7d   :  { %v462_v16 = vld [vmem:[#allocation2] sm:$0xff]  ;;  %378 = vst [vmem:[#allocation2 + $0xe] sm:$0x1] %v377_v38  ;;  %s1589_s25 = sld [smem:[#allocation4 + $0x32]]  ;;  %s111_s27 = scalar_lea.vmem [#allocation5], %s1535_s17 }
  0x7e   :  { %v422_v39 = vld [vmem:[%s421_s5] sm:$0x1]  ;;  %s1598_s26 = sld [smem:[#allocation4 + $0x3a]]  ;;  %s156_s28 = scalar_lea.vmem [#allocation5], %s1544_s18 }
  0x7f   :  { %423 = vst [vmem:[#allocation2 + $0xf] sm:$0x1] %v422_v39  ;;  %v112_v57 = vld [vmem:[%s111_s27] sm:$0x1]  ;;  %s201_s1 = scalar_lea.vmem [#allocation5], %s1553_s21  ;;  %s1563_s16 = sld [smem:[#allocation4 + $0x1b]] }
  0x80   :  { %v157_v58 = vld [vmem:[%s156_s28] sm:$0x1]  ;;  %113 = vst [vmem:[#allocation2 + $0x10] sm:$0x1] %v112_v57  ;;  %s246_s30 = scalar_lea.vmem [#allocation5], %s1562_s22  ;;  %s1572_s3 = sld [smem:[#allocation4 + $0x23]] }
  0x81   :  { %158 = vst [vmem:[#allocation2 + $0x11] sm:$0x1] %v157_v58  ;;  %v202_v59 = vld [vmem:[%s201_s1] sm:$0x1]  ;;  %s291_s8 = scalar_lea.vmem [#allocation5], %s1571_s23  ;;  %s1581_s10 = sld [smem:[#allocation4 + $0x2b]] }
  0x82   :  { %v247_v60 = vld [vmem:[%s246_s30] sm:$0x1]  ;;  %203 = vst [vmem:[#allocation2 + $0x12] sm:$0x1] %v202_v59  ;;  %s336_s9 = scalar_lea.vmem [#allocation5], %s1580_s24  ;;  %s1590_s19 = sld [smem:[#allocation4 + $0x33]] }
  0x83   :  { %248 = vst [vmem:[#allocation2 + $0x13] sm:$0x1] %v247_v60  ;;  %v292_v61 = vld [vmem:[%s291_s8] sm:$0x1]  ;;  %s381_s11 = scalar_lea.vmem [#allocation5], %s1589_s25  ;;  %s1599_s4 = sld [smem:[#allocation4 + $0x3b]] }
  0x84   :  { %v337_v62 = vld [vmem:[%s336_s9] sm:$0x1]  ;;  %293 = vst [vmem:[#allocation2 + $0x14] sm:$0x1] %v292_v61  ;;  %s426_s12 = scalar_lea.vmem [#allocation5], %s1598_s26  ;;  %s116_s0 = scalar_lea.vmem [#allocation5], %s1536_s13 }
  0x85   :  { %338 = vst [vmem:[#allocation2 + $0x15] sm:$0x1] %v337_v62  ;;  %v382_v2 = vld [vmem:[%s381_s11] sm:$0x1]  ;;  %s161_s20 = scalar_lea.vmem [#allocation5], %s1545_s14  ;;  %s206_s5 = scalar_lea.vmem [#allocation5], %s1554_s15 }
  0x86   :  { %v562_v42 = vld [vmem:[#allocation2 + $0x8] sm:$0xff]  ;;  %v427_v3 = vld [vmem:[%s426_s12] sm:$0x1]  ;;  %383 = vst [vmem:[#allocation2 + $0x16] sm:$0x1] %v382_v2  ;;  %s251_s17 = scalar_lea.vmem [#allocation5], %s1563_s16 }
  0x87   :  { %428 = vst [vmem:[#allocation2 + $0x17] sm:$0x1] %v427_v3  ;;  %s296_s18 = scalar_lea.vmem [#allocation5], %s1572_s3  ;;  %s341_s21 = scalar_lea.vmem [#allocation5], %s1581_s10 }
  0x88   :  { %s386_s22 = scalar_lea.vmem [#allocation5], %s1590_s19  ;;  %s1537_s24 = sld [smem:[#allocation4 + $0x4]] }
  0x89   :  { %s431_s23 = scalar_lea.vmem [#allocation5], %s1599_s4  ;;  %s1546_s25 = sld [smem:[#allocation4 + $0xc]] }
  0x8a   :  { %v432_v31 = vld [vmem:[%s431_s23] sm:$0x1]  ;;  %s1555_s26 = sld [smem:[#allocation4 + $0x14]]  ;;  %s1538_s10 = sld [smem:[#allocation4 + $0x5]] }
  0x8b   :  { %433 = vst [vmem:[#allocation2 + $0x1f] sm:$0x1] %v432_v31  ;;  %s1564_s27 = sld [smem:[#allocation4 + $0x1c]]  ;;  %s1547_s19 = sld [smem:[#allocation4 + $0xd]] }
  0x8c   :  { %s1573_s28 = sld [smem:[#allocation4 + $0x24]]  ;;  %s1556_s4 = sld [smem:[#allocation4 + $0x15]] }
  0x8d   :  { %s1582_s1 = sld [smem:[#allocation4 + $0x2c]] }
  0x8e   :  { %v663_v7 = vld [vmem:[#allocation2 + $0x10] sm:$0xff]  ;;  %s1591_s30 = sld [smem:[#allocation4 + $0x34]]  ;;  %s121_s9 = scalar_lea.vmem [#allocation5], %s1537_s24 }
  0x8f   :  { %s1600_s8 = sld [smem:[#allocation4 + $0x3c]]  ;;  %s166_s11 = scalar_lea.vmem [#allocation5], %s1546_s25 }
  0x90   :  { %s211_s12 = scalar_lea.vmem [#allocation5], %s1555_s26 }
  0x91   :  { %s256_s13 = scalar_lea.vmem [#allocation5], %s1564_s27 }
  0x92   :  { %s301_s14 = scalar_lea.vmem [#allocation5], %s1573_s28  ;;  %s216_s23 = scalar_lea.vmem [#allocation5], %s1556_s4 }
  0x93   :  { %s346_s15 = scalar_lea.vmem [#allocation5], %s1582_s1  ;;  %s1539_s1 = sld [smem:[#allocation4 + $0x6]] }
  0x94   :  { %s391_s16 = scalar_lea.vmem [#allocation5], %s1591_s30  ;;  %s1548_s30 = sld [smem:[#allocation4 + $0xe]] }
  0x95   :  { %s436_s3 = scalar_lea.vmem [#allocation5], %s1600_s8  ;;  %s1557_s8 = sld [smem:[#allocation4 + $0x16]] }
  0x96   :  { %v437_v57 = vld [vmem:[%s436_s3] sm:$0x1] }
  0x97   :  { %438 = vst [vmem:[#allocation2 + $0x27] sm:$0x1] %v437_v57 }
  0x9b   :  { %s221_s3 = scalar_lea.vmem [#allocation5], %s1557_s8 }
 0x145   :  { %v533_v17 = vpop.f32.mrb[0].mxu0 }
 0x146   :  { %v537_v18 = vadd.f32 %v533_v17, %v462_v16  ;;  %v1684_v19 = vpop.f32.mrb[1].mxu0 }
 0x148   :  { %1858 = vtanh.f32 %v537_v18  ;;  %v1605_v21 = vmul.f32 -1.442695, %v537_v18 }
 0x14a   :  { %1860 = vpow2.f32 %v1605_v21 }
 0x152   :  { %v1859_v20 = vpop.eup %1858 }
 0x153   :  { %547 = vrot.lane.b32.xlu0 %v1859_v20, %s2071_s2 }
 0x154   :  { %v1861_v22 = vpop.eup %1860 }
 0x155   :  { %v541_v23 = vadd.f32 1.0, %v1861_v22 }
 0x157   :  { %1862 = vrcp.f32 %v541_v23  ;;  %v117_v23 = vld [vmem:[%s116_s0] sm:$0x1]  ;;  %s1565_s0 = sld [smem:[#allocation4 + $0x1d]] }
 0x158   :  { %118 = vst [vmem:[#allocation2 + $0x18] sm:$0x1] %v117_v23 }
 0x15d   :  { %s261_s24 = scalar_lea.vmem [#allocation5], %s1565_s0 }
 0x161   :  { %v1863_v24 = vpop.eup %1862 }
 0x162   :  { %v545_v27 = vmul.f32 0.0, %v1863_v24 }
 0x1c5   :  { %v548_v25 = vpop.permute.xlu0 %547 }
 0x1c6   :  { %v550_v26 = vmul.f32 %v1863_v24, %v548_v25  ;;  %v207_v25 = vld [vmem:[%s206_s5] sm:$0x1]  ;;  %s1583_s5 = sld [smem:[#allocation4 + $0x2d]] }
 0x1c7   :  { %208 = vst [vmem:[#allocation2 + $0x1a] sm:$0x1] %v207_v25 }
 0x1c8   :  { %552 = vrot.lane.b32.xlu0 %v550_v26, %s2072_s29  ;;  %v252_v26 = vld [vmem:[%s251_s17] sm:$0x1]  ;;  %s1592_s17 = sld [smem:[#allocation4 + $0x35]] }
 0x1c9   :  { %253 = vst [vmem:[#allocation2 + $0x1b] sm:$0x1] %v252_v26 }
 0x1cc   :  { %s351_s26 = scalar_lea.vmem [#allocation5], %s1583_s5  ;;  %s2309_s5 = sld [smem:[#allocation4 + $0x7]] }
 0x1ce   :  { %s396_s27 = scalar_lea.vmem [#allocation5], %s1592_s17  ;;  %s2311_s17 = sld [smem:[#allocation4 + $0xf]] }
 0x23a   :  { %v553_v28 = vpop.permute.xlu0 %552 }
 0x23b   :  { %v2239_v29 = vadd.f32 %v553_v28, %v545_v27  ;;  %v297_v27 = vld [vmem:[%s296_s18] sm:$0x1]  ;;  %s1601_s18 = sld [smem:[#allocation4 + $0x3d]] }
 0x23c   :  { %v342_v28 = vld [vmem:[%s341_s21] sm:$0x1]  ;;  %298 = vst [vmem:[#allocation2 + $0x1c] sm:$0x1] %v297_v27  ;;  %s126_s21 = scalar_lea.vmem [#allocation5], %s1538_s10 }
 0x23d   :  { %1864 = vtanh.f32 %v2239_v29  ;;  %343 = vst [vmem:[#allocation2 + $0x1d] sm:$0x1] %v342_v28 }
 0x241   :  { %s441_s28 = scalar_lea.vmem [#allocation5], %s1601_s18  ;;  %s2313_s18 = sld [smem:[#allocation4 + $0x17]] }
 0x242   :  { %v442_v23 = vld [vmem:[%s441_s28] sm:$0x1] }
 0x243   :  { %443 = vst [vmem:[#allocation2 + $0x2f] sm:$0x1] %v442_v23 }
 0x247   :  { %v1865_v30 = vpop.eup %1864  ;;  %s226_s28 = scalar_lea.vmem [#allocation5], %s2313_s18 }
 0x248   :  { %558 = vrot.lane.b32.xlu1 %v1865_v30, %s2071_s2  ;;  %v387_v30 = vld [vmem:[%s386_s22] sm:$0x1]  ;;  %s171_s22 = scalar_lea.vmem [#allocation5], %s1547_s19 }
 0x249   :  { %388 = vst [vmem:[#allocation2 + $0x1e] sm:$0x1] %v387_v30 }
 0x2ba   :  { %v559_v37 = vpop.permute.xlu1 %558 }
 0x2bb   :  { %v561_v40 = vmul.f32 %v1863_v24, %v559_v37  ;;  %v162_v24 = vld [vmem:[%s161_s20] sm:$0x1]  ;;  %s1574_s20 = sld [smem:[#allocation4 + $0x25]] }
 0x2bc   :  { %163 = vst [vmem:[#allocation2 + $0x19] sm:$0x1] %v162_v24 }
 0x2bd   :  { %564 = vrot.lane.b32.xlu1 %v561_v40, %s2072_s29 }
 0x2c1   :  { %s306_s25 = scalar_lea.vmem [#allocation5], %s1574_s20 }
 0x2c3   :  { %v764_v34 = vld [vmem:[#allocation2 + $0x18] sm:$0xff] }
 0x32f   :  { %v565_v41 = vpop.permute.xlu1 %564 }
 0x330   :  { %1694 = vmatmul.mubr.msk.f32.vlgmr.msra.gmra.mrb[0].mxu1 %vm463_vm1, %v565_v41 }
 0x331   :  { %1804 = vmatpush3.bf16.msra.mxu1 %v2216_v5  ;;  %1715 = vmatprep.mubr.msk.f32.mxu1 %vm2069_vm0, %v2070_v1 }
 0x332   :  { %1805 = vmatprep.subr.bf16.mxu1 %v2068_v0 }
 0x335   :  { %1807 = vmatpush3.bf16.msra.mxu1 %v2219_v10 }
 0x336   :  { %1814 = vmatprep.subr.bf16.mxu1 %v2068_v0 }
 0x403   :  { %v634_v43 = vpop.f32.mrb[0].mxu1 }
 0x404   :  { %v638_v44 = vadd.f32 %v634_v43, %v562_v42  ;;  %v1695_v45 = vpop.f32.mrb[1].mxu1 }
 0x406   :  { %1866 = vtanh.f32 %v638_v44  ;;  %v1607_v47 = vmul.f32 -1.442695, %v638_v44 }
 0x408   :  { %1868 = vpow2.f32 %v1607_v47 }
 0x410   :  { %v1867_v46 = vpop.eup %1866 }
 0x411   :  { %648 = vrot.lane.b32.xlu0 %v1867_v46, %s2071_s2 }
 0x412   :  { %v1869_v48 = vpop.eup %1868 }
 0x413   :  { %v642_v49 = vadd.f32 1.0, %v1869_v48 }
 0x415   :  { %1870 = vrcp.f32 %v642_v49  ;;  %v122_v49 = vld [vmem:[%s121_s9] sm:$0x1]  ;;  %s1566_s9 = sld [smem:[#allocation4 + $0x1e]] }
 0x416   :  { %123 = vst [vmem:[#allocation2 + $0x20] sm:$0x1] %v122_v49 }
 0x41b   :  { %s266_s10 = scalar_lea.vmem [#allocation5], %s1566_s9 }
 0x41f   :  { %v1871_v50 = vpop.eup %1870 }
 0x420   :  { %v646_v53 = vmul.f32 %v1871_v50, %v2239_v29 }
 0x483   :  { %v649_v51 = vpop.permute.xlu0 %648 }
 0x484   :  { %v651_v52 = vmul.f32 %v1871_v50, %v649_v51  ;;  %v212_v51 = vld [vmem:[%s211_s12] sm:$0x1]  ;;  %s1584_s12 = sld [smem:[#allocation4 + $0x2e]] }
 0x485   :  { %213 = vst [vmem:[#allocation2 + $0x22] sm:$0x1] %v212_v51 }
 0x486   :  { %653 = vrot.lane.b32.xlu1 %v651_v52, %s2072_s29  ;;  %v257_v52 = vld [vmem:[%s256_s13] sm:$0x1]  ;;  %s1593_s13 = sld [smem:[#allocation4 + $0x36]] }
 0x487   :  { %258 = vst [vmem:[#allocation2 + $0x23] sm:$0x1] %v257_v52 }
 0x48a   :  { %s356_s4 = scalar_lea.vmem [#allocation5], %s1584_s12  ;;  %s140_s12 = scalar_lea.vmem [#allocation7], %s2309_s5 }
 0x48c   :  { %s401_s0 = scalar_lea.vmem [#allocation5], %s1593_s13  ;;  %s185_s13 = scalar_lea.vmem [#allocation7], %s2311_s17 }
 0x4f8   :  { %v654_v54 = vpop.permute.xlu1 %653 }
 0x4f9   :  { %v656_v55 = vadd.f32 %v654_v54, %v646_v53  ;;  %v302_v53 = vld [vmem:[%s301_s14] sm:$0x1]  ;;  %s1602_s14 = sld [smem:[#allocation4 + $0x3e]] }
 0x4fa   :  { %v347_v54 = vld [vmem:[%s346_s15] sm:$0x1]  ;;  %303 = vst [vmem:[#allocation2 + $0x24] sm:$0x1] %v302_v53  ;;  %s131_s15 = scalar_lea.vmem [#allocation5], %s1539_s1 }
 0x4fb   :  { %1872 = vtanh.f32 %v656_v55  ;;  %348 = vst [vmem:[#allocation2 + $0x25] sm:$0x1] %v347_v54 }
 0x4ff   :  { %s446_s20 = scalar_lea.vmem [#allocation5], %s1602_s14  ;;  %s230_s14 = scalar_lea.vmem [#allocation7], %s2313_s18 }
 0x505   :  { %v1873_v56 = vpop.eup %1872 }
 0x506   :  { %659 = vrot.lane.b32.xlu0 %v1873_v56, %s2071_s2  ;;  %v392_v56 = vld [vmem:[%s391_s16] sm:$0x1]  ;;  %s176_s16 = scalar_lea.vmem [#allocation5], %s1548_s30 }
 0x507   :  { %393 = vst [vmem:[#allocation2 + $0x26] sm:$0x1] %v392_v56 }
 0x578   :  { %v660_v63 = vpop.permute.xlu0 %659 }
 0x579   :  { %v662_v4 = vmul.f32 %v1871_v50, %v660_v63  ;;  %v167_v50 = vld [vmem:[%s166_s11] sm:$0x1]  ;;  %s1575_s11 = sld [smem:[#allocation4 + $0x26]] }
 0x57a   :  { %168 = vst [vmem:[#allocation2 + $0x21] sm:$0x1] %v167_v50 }
 0x57b   :  { %665 = vrot.lane.b32.xlu1 %v662_v4, %s2072_s29 }
 0x57f   :  { %s311_s19 = scalar_lea.vmem [#allocation5], %s1575_s11 }
 0x581   :  { %v865_v60 = vld [vmem:[#allocation2 + $0x20] sm:$0xff] }
 0x5ed   :  { %v666_v6 = vpop.permute.xlu1 %665 }
 0x5ee   :  { %1705 = vmatmul.mubr.msk.f32.vlgmr.msra.gmra.mrb[2].mxu0 %vm463_vm1, %v666_v6 }
 0x5ef   :  { %1810 = vmatpush3.bf16.msra.mxu0 %v2216_v5  ;;  %1726 = vmatprep.mubr.msk.f32.mxu0 %vm2069_vm0, %v2070_v1 }
 0x5f0   :  { %1811 = vmatprep.subr.bf16.mxu0 %v2068_v0 }
 0x5f3   :  { %1813 = vmatpush3.bf16.msra.mxu0 %v2219_v10 }
 0x5f4   :  { %1820 = vmatprep.subr.bf16.mxu0 %v2068_v0 }
 0x6c1   :  { %v735_v8 = vpop.f32.mrb[2].mxu0 }
 0x6c2   :  { %v739_v9 = vadd.f32 %v735_v8, %v663_v7  ;;  %v1706_v11 = vpop.f32.mrb[3].mxu0 }
 0x6c4   :  { %1874 = vtanh.f32 %v739_v9  ;;  %v1609_v13 = vmul.f32 -1.442695, %v739_v9 }
 0x6c6   :  { %1876 = vpow2.f32 %v1609_v13 }
 0x6ce   :  { %v1875_v12 = vpop.eup %1874 }
 0x6cf   :  { %749 = vrot.lane.b32.xlu0 %v1875_v12, %s2071_s2 }
 0x6d0   :  { %v1877_v14 = vpop.eup %1876 }
 0x6d1   :  { %v743_v15 = vadd.f32 1.0, %v1877_v14 }
 0x6d3   :  { %1878 = vrcp.f32 %v743_v15  ;;  %v127_v15 = vld [vmem:[%s126_s21] sm:$0x1]  ;;  %s2315_s21 = sld [smem:[#allocation4 + $0x1f]] }
 0x6d4   :  { %128 = vst [vmem:[#allocation2 + $0x28] sm:$0x1] %v127_v15 }
 0x6d9   :  { %s271_s1 = scalar_lea.vmem [#allocation5], %s2315_s21 }
 0x6dd   :  { %v1879_v16 = vpop.eup %1878 }
 0x6de   :  { %v747_v19 = vmul.f32 %v1879_v16, %v656_v55 }
 0x741   :  { %v750_v17 = vpop.permute.xlu0 %749 }
 0x742   :  { %v752_v18 = vmul.f32 %v1879_v16, %v750_v17  ;;  %v217_v17 = vld [vmem:[%s216_s23] sm:$0x1]  ;;  %s2319_s23 = sld [smem:[#allocation4 + $0x2f]] }
 0x743   :  { %218 = vst [vmem:[#allocation2 + $0x2a] sm:$0x1] %v217_v17  ;;  %v186_v17 = vld [vmem:[%s185_s13] sm:$0x1] }
 0x744   :  { %754 = vrot.lane.b32.xlu1 %v752_v18, %s2072_s29  ;;  %v262_v18 = vld [vmem:[%s261_s24] sm:$0x1]  ;;  %s2321_s24 = sld [smem:[#allocation4 + $0x37]]  ;;  %187 = vst [vmem:[#allocation2 + $0x41] sm:$0x1] %v186_v17 }
 0x745   :  { %263 = vst [vmem:[#allocation2 + $0x2b] sm:$0x1] %v262_v18  ;;  %v231_v18 = vld [vmem:[%s230_s14] sm:$0x1] }
 0x746   :  { %232 = vst [vmem:[#allocation2 + $0x42] sm:$0x1] %v231_v18 }
 0x748   :  { %s361_s8 = scalar_lea.vmem [#allocation5], %s2319_s23 }
 0x74a   :  { %s406_s9 = scalar_lea.vmem [#allocation5], %s2321_s24 }
 0x7b6   :  { %v755_v20 = vpop.permute.xlu1 %754 }
 0x7b7   :  { %v757_v21 = vadd.f32 %v755_v20, %v747_v19  ;;  %v307_v19 = vld [vmem:[%s306_s25] sm:$0x1]  ;;  %s2323_s25 = sld [smem:[#allocation4 + $0x3f]] }
 0x7b8   :  { %v352_v20 = vld [vmem:[%s351_s26] sm:$0x1]  ;;  %308 = vst [vmem:[#allocation2 + $0x2c] sm:$0x1] %v307_v19  ;;  %s136_s26 = scalar_lea.vmem [#allocation5], %s2309_s5 }
 0x7b9   :  { %1880 = vtanh.f32 %v757_v21  ;;  %353 = vst [vmem:[#allocation2 + $0x2d] sm:$0x1] %v352_v20 }
 0x7bd   :  { %s451_s11 = scalar_lea.vmem [#allocation5], %s2323_s25 }
 0x7c3   :  { %v1881_v22 = vpop.eup %1880 }
 0x7c4   :  { %760 = vrot.lane.b32.xlu0 %v1881_v22, %s2071_s2  ;;  %v397_v22 = vld [vmem:[%s396_s27] sm:$0x1]  ;;  %s181_s27 = scalar_lea.vmem [#allocation5], %s2311_s17 }
 0x7c5   :  { %398 = vst [vmem:[#allocation2 + $0x2e] sm:$0x1] %v397_v22 }
 0x836   :  { %v761_v29 = vpop.permute.xlu0 %760 }
 0x837   :  { %v763_v32 = vmul.f32 %v1879_v16, %v761_v29  ;;  %v172_v16 = vld [vmem:[%s171_s22] sm:$0x1]  ;;  %s2317_s22 = sld [smem:[#allocation4 + $0x27]] }
 0x838   :  { %173 = vst [vmem:[#allocation2 + $0x29] sm:$0x1] %v172_v16  ;;  %v141_v16 = vld [vmem:[%s140_s12] sm:$0x1] }
 0x839   :  { %766 = vrot.lane.b32.xlu1 %v763_v32, %s2072_s29  ;;  %142 = vst [vmem:[#allocation2 + $0x40] sm:$0x1] %v141_v16 }
 0x83d   :  { %s316_s30 = scalar_lea.vmem [#allocation5], %s2317_s22 }
 0x83f   :  { %v966_v26 = vld [vmem:[#allocation2 + $0x28] sm:$0xff] }
 0x8ab   :  { %v767_v33 = vpop.permute.xlu1 %766 }
 0x8ac   :  { %1716 = vmatmul.mubr.msk.f32.vlgmr.msra.gmra.mrb[2].mxu1 %vm463_vm1, %v767_v33 }
 0x8ad   :  { %1816 = vmatpush3.bf16.msra.mxu1 %v2216_v5  ;;  %1737 = vmatprep.mubr.msk.f32.mxu1 %vm2069_vm0, %v2070_v1 }
 0x8ae   :  { %1817 = vmatprep.subr.bf16.mxu1 %v2068_v0 }
 0x8b1   :  { %1819 = vmatpush3.bf16.msra.mxu1 %v2219_v10 }
 0x8b2   :  { %1826 = vmatprep.subr.bf16.mxu1 %v2068_v0 }
 0x97f   :  { %v836_v35 = vpop.f32.mrb[2].mxu1 }
 0x980   :  { %v840_v36 = vadd.f32 %v836_v35, %v764_v34  ;;  %v1717_v37 = vpop.f32.mrb[3].mxu1 }
 0x982   :  { %1882 = vtanh.f32 %v840_v36  ;;  %v1611_v39 = vmul.f32 -1.442695, %v840_v36 }
 0x984   :  { %1884 = vpow2.f32 %v1611_v39  ;;  %v132_v39 = vld [vmem:[%s131_s15] sm:$0x1]  ;;  %s275_s15 = scalar_lea.vmem [#allocation7], %s2315_s21 }
 0x985   :  { %133 = vst [vmem:[#allocation2 + $0x30] sm:$0x1] %v132_v39  ;;  %v276_v19 = vld [vmem:[%s275_s15] sm:$0x1] }
 0x986   :  { %277 = vst [vmem:[#allocation2 + $0x43] sm:$0x1] %v276_v19 }
 0x98c   :  { %v1883_v38 = vpop.eup %1882 }
 0x98d   :  { %850 = vrot.lane.b32.xlu0 %v1883_v38, %s2071_s2 }
 0x98e   :  { %v1885_v40 = vpop.eup %1884 }
 0x98f   :  { %v844_v41 = vadd.f32 1.0, %v1885_v40  ;;  %v177_v40 = vld [vmem:[%s176_s16] sm:$0x1]  ;;  %s320_s16 = scalar_lea.vmem [#allocation7], %s2317_s22 }
 0x990   :  { %178 = vst [vmem:[#allocation2 + $0x31] sm:$0x1] %v177_v40  ;;  %v321_v20 = vld [vmem:[%s320_s16] sm:$0x1] }
 0x991   :  { %1886 = vrcp.f32 %v844_v41  ;;  %v222_v41 = vld [vmem:[%s221_s3] sm:$0x1]  ;;  %s365_s3 = scalar_lea.vmem [#allocation7], %s2319_s23  ;;  %322 = vst [vmem:[#allocation2 + $0x44] sm:$0x1] %v321_v20 }
 0x992   :  { %223 = vst [vmem:[#allocation2 + $0x32] sm:$0x1] %v222_v41 }
 0x99b   :  { %v1887_v42 = vpop.eup %1886 }
 0x99c   :  { %v848_v45 = vmul.f32 %v1887_v42, %v757_v21 }
 0x9ff   :  { %v851_v43 = vpop.permute.xlu0 %850 }
 0xa00   :  { %v853_v44 = vmul.f32 %v1887_v42, %v851_v43  ;;  %v312_v43 = vld [vmem:[%s311_s19] sm:$0x1]  ;;  %s455_s19 = scalar_lea.vmem [#allocation7], %s2323_s25 }
 0xa01   :  { %313 = vst [vmem:[#allocation2 + $0x34] sm:$0x1] %v312_v43  ;;  %v456_v22 = vld [vmem:[%s455_s19] sm:$0x1] }
 0xa02   :  { %855 = vrot.lane.b32.xlu1 %v853_v44, %s2072_s29  ;;  %v357_v44 = vld [vmem:[%s356_s4] sm:$0x1]  ;;  %457 = vst [vmem:[#allocation2 + $0x47] sm:$0x1] %v456_v22  ;;  %s2073_s4 = smov 96  }
 0xa03   :  { %358 = vst [vmem:[#allocation2 + $0x35] sm:$0x1] %v357_v44  ;;  %v1292_v44 = vld [vmem:[#allocation12] sm:$0xff] }
 0xa74   :  { %v856_v46 = vpop.permute.xlu1 %855 }
 0xa75   :  { %v858_v47 = vadd.f32 %v856_v46, %v848_v45  ;;  %v402_v46 = vld [vmem:[%s401_s0] sm:$0x1] }
 0xa76   :  { %403 = vst [vmem:[#allocation2 + $0x36] sm:$0x1] %v402_v46  ;;  %v1288_v46 = vld [vmem:[#allocation10] sm:$0xff] }
 0xa77   :  { %1888 = vtanh.f32 %v858_v47 }
 0xa81   :  { %v1889_v48 = vpop.eup %1888 }
 0xa82   :  { %861 = vrot.lane.b32.xlu0 %v1889_v48, %s2071_s2 }
 0xaf4   :  { %v862_v55 = vpop.permute.xlu0 %861 }
 0xaf5   :  { %v864_v58 = vmul.f32 %v1887_v42, %v862_v55  ;;  %v267_v42 = vld [vmem:[%s266_s10] sm:$0x1]  ;;  %s410_s10 = scalar_lea.vmem [#allocation7], %s2321_s24 }
 0xaf6   :  { %268 = vst [vmem:[#allocation2 + $0x33] sm:$0x1] %v267_v42 }
 0xaf7   :  { %867 = vrot.lane.b32.xlu1 %v864_v58, %s2072_s29 }
 0xb69   :  { %v868_v59 = vpop.permute.xlu1 %867 }
 0xb6a   :  { %1727 = vmatmul.mubr.msk.f32.vlgmr.msra.gmra.mrb[4].mxu0 %vm463_vm1, %v868_v59 }
 0xb6b   :  { %1822 = vmatpush3.bf16.msra.mxu0 %v2216_v5  ;;  %1748 = vmatprep.mubr.msk.f32.mxu0 %vm2069_vm0, %v2070_v1 }
 0xb6c   :  { %1823 = vmatprep.subr.bf16.mxu0 %v2068_v0 }
 0xb6f   :  { %1825 = vmatpush3.bf16.msra.mxu0 %v2219_v10 }
 0xb70   :  { %1832 = vmatprep.subr.bf16.mxu0 %v2068_v0 }
 0xc3d   :  { %v937_v61 = vpop.f32.mrb[4].mxu0 }
 0xc3e   :  { %v941_v62 = vadd.f32 %v937_v61, %v865_v60  ;;  %v1728_v63 = vpop.f32.mrb[5].mxu0 }
 0xc40   :  { %1890 = vtanh.f32 %v941_v62  ;;  %v1613_v3 = vmul.f32 -1.442695, %v941_v62 }
 0xc42   :  { %1892 = vpow2.f32 %v1613_v3  ;;  %v137_v3 = vld [vmem:[%s136_s26] sm:$0x1] }
 0xc43   :  { %138 = vst [vmem:[#allocation2 + $0x38] sm:$0x1] %v137_v3  ;;  %v1623_v3 = vld [vmem:[%s2368_s6] ss:$0 sm:$0xff] }
 0xc4a   :  { %v1891_v2 = vpop.eup %1890 }
 0xc4b   :  { %951 = vrot.lane.b32.xlu0 %v1891_v2, %s2071_s2 }
 0xc4c   :  { %v1893_v4 = vpop.eup %1892 }
 0xc4d   :  { %v945_v6 = vadd.f32 1.0, %v1893_v4  ;;  %v182_v4 = vld [vmem:[%s181_s27] sm:$0x1] }
 0xc4e   :  { %183 = vst [vmem:[#allocation2 + $0x39] sm:$0x1] %v182_v4 }
 0xc4f   :  { %1894 = vrcp.f32 %v945_v6  ;;  %v227_v6 = vld [vmem:[%s226_s28] sm:$0x1] }
 0xc50   :  { %228 = vst [vmem:[#allocation2 + $0x3a] sm:$0x1] %v227_v6 }
 0xc59   :  { %v1895_v7 = vpop.eup %1894 }
 0xc5a   :  { %v949_v11 = vmul.f32 %v1895_v7, %v858_v47  ;;  %v447_v47 = vld [vmem:[%s446_s20] sm:$0x1] }
 0xc5b   :  { %448 = vst [vmem:[#allocation2 + $0x37] sm:$0x1] %v447_v47 }
 0xc62   :  { %v1067_v50 = vld [vmem:[#allocation2 + $0x30] sm:$0xff] }
 0xcbd   :  { %v952_v8 = vpop.permute.xlu0 %951 }
 0xcbe   :  { %v954_v9 = vmul.f32 %v1895_v7, %v952_v8  ;;  %v317_v8 = vld [vmem:[%s316_s30] sm:$0x1] }
 0xcbf   :  { %318 = vst [vmem:[#allocation2 + $0x3c] sm:$0x1] %v317_v8 }
 0xcc0   :  { %956 = vrot.lane.b32.xlu1 %v954_v9, %s2072_s29  ;;  %v362_v9 = vld [vmem:[%s361_s8] sm:$0x1] }
 0xcc1   :  { %363 = vst [vmem:[#allocation2 + $0x3d] sm:$0x1] %v362_v9 }
 0xd32   :  { %v957_v12 = vpop.permute.xlu1 %956 }
 0xd33   :  { %v959_v13 = vadd.f32 %v957_v12, %v949_v11  ;;  %v407_v12 = vld [vmem:[%s406_s9] sm:$0x1] }
 0xd34   :  { %408 = vst [vmem:[#allocation2 + $0x3e] sm:$0x1] %v407_v12 }
 0xd35   :  { %1896 = vtanh.f32 %v959_v13 }
 0xd3f   :  { %v1897_v14 = vpop.eup %1896 }
 0xd40   :  { %962 = vrot.lane.b32.xlu0 %v1897_v14, %s2071_s2 }
 0xdb2   :  { %v963_v21 = vpop.permute.xlu0 %962 }
 0xdb3   :  { %v965_v24 = vmul.f32 %v1895_v7, %v963_v21  ;;  %v272_v7 = vld [vmem:[%s271_s1] sm:$0x1] }
 0xdb4   :  { %273 = vst [vmem:[#allocation2 + $0x3b] sm:$0x1] %v272_v7  ;;  %v366_v21 = vld [vmem:[%s365_s3] sm:$0x1] }
 0xdb5   :  { %968 = vrot.lane.b32.xlu1 %v965_v24, %s2072_s29  ;;  %367 = vst [vmem:[#allocation2 + $0x45] sm:$0x1] %v366_v21 }
 0xe27   :  { %v969_v25 = vpop.permute.xlu1 %968 }
 0xe28   :  { %1738 = vmatmul.mubr.msk.f32.vlgmr.msra.gmra.mrb[4].mxu1 %vm463_vm1, %v969_v25 }
 0xe29   :  { %1828 = vmatpush3.bf16.msra.mxu1 %v2216_v5  ;;  %1759 = vmatprep.mubr.msk.f32.mxu1 %vm2069_vm0, %v2070_v1 }
 0xe2a   :  { %1829 = vmatprep.subr.bf16.mxu1 %v2068_v0 }
 0xe2d   :  { %1831 = vmatpush3.bf16.msra.mxu1 %v2219_v10 }
 0xe2e   :  { %1838 = vmatprep.subr.bf16.mxu1 %v2068_v0 }
 0xefb   :  { %v1038_v27 = vpop.f32.mrb[4].mxu1 }
 0xefc   :  { %v1042_v28 = vadd.f32 %v1038_v27, %v966_v26  ;;  %v1739_v29 = vpop.f32.mrb[5].mxu1 }
 0xefe   :  { %1898 = vtanh.f32 %v1042_v28  ;;  %v1615_v31 = vmul.f32 -1.442695, %v1042_v28 }
 0xf00   :  { %1900 = vpow2.f32 %v1615_v31 }
 0xf08   :  { %v1899_v30 = vpop.eup %1898 }
 0xf09   :  { %1052 = vrot.lane.b32.xlu0 %v1899_v30, %s2071_s2 }
 0xf0a   :  { %v1901_v5 = vpop.eup %1900 }
 0xf0b   :  { %v1046_v32 = vadd.f32 1.0, %v1901_v5 }
 0xf0d   :  { %1902 = vrcp.f32 %v1046_v32 }
 0xf17   :  { %v1903_v33 = vpop.eup %1902 }
 0xf18   :  { %v1050_v10 = vmul.f32 %v1903_v33, %v959_v13  ;;  %v452_v13 = vld [vmem:[%s451_s11] sm:$0x1] }
 0xf19   :  { %453 = vst [vmem:[#allocation2 + $0x3f] sm:$0x1] %v452_v13 }
 0xf20   :  { %v1168_v23 = vld [vmem:[#allocation2 + $0x38] sm:$0xff] }
 0xf7b   :  { %v1053_v34 = vpop.permute.xlu0 %1052 }
 0xf7c   :  { %v1055_v35 = vmul.f32 %v1903_v33, %v1053_v34 }
 0xf7e   :  { %1057 = vrot.lane.b32.xlu1 %v1055_v35, %s2072_s29 }
 0xff0   :  { %v1058_v36 = vpop.permute.xlu1 %1057 }
 0xff1   :  { %v1060_v37 = vadd.f32 %v1058_v36, %v1050_v10 }
 0xff3   :  { %1904 = vtanh.f32 %v1060_v37 }
 0xffd   :  { %v1905_v38 = vpop.eup %1904 }
 0xffe   :  { %1063 = vrot.lane.b32.xlu0 %v1905_v38, %s2071_s2 }
0x1070   :  { %v1064_v45 = vpop.permute.xlu0 %1063 }
0x1071   :  { %v1066_v48 = vmul.f32 %v1903_v33, %v1064_v45  ;;  %v1293_v45 = vld [vmem:[#allocation12 + $0x8] sm:$0xff] }
0x1072   :  { %v1833_v47 = vpack.c.bf16 %v1293_v45, %v1292_v44 }
0x1073   :  { %1069 = vrot.lane.b32.xlu1 %v1066_v48, %s2072_s29  ;;  %v1289_v48 = vld [vmem:[#allocation10 + $0x8] sm:$0xff] }
0x10e5   :  { %v1070_v49 = vpop.permute.xlu1 %1069 }
0x10e6   :  { %1749 = vmatmul.mubr.msk.f32.vlgmr.msra.gmra.mrb[6].mxu0 %vm463_vm1, %v1070_v49  ;;  %v1294_v49 = vld [vmem:[#allocation12 + $0x10] sm:$0xff] }
0x10e7   :  { %1770 = vmatprep.mubr.msk.f32.mxu0 %vm2069_vm0, %v2070_v1  ;;  %1834 = vmatpush3.bf16.msra.mxu0 %v1833_v47 }
0x10e8   :  { %1835 = vmatprep.subr.bf16.mxu0 %v2068_v0 }
0x11b9   :  { %v1139_v51 = vpop.f32.mrb[6].mxu0 }
0x11ba   :  { %v1143_v52 = vadd.f32 %v1139_v51, %v1067_v50  ;;  %v1750_v53 = vpop.f32.mrb[7].mxu0  ;;  %v1295_v50 = vld [vmem:[#allocation12 + $0x18] sm:$0xff]  ;;  %v1839_v51 = vpack.c.bf16 %v1289_v48, %v1288_v46 }
0x11bb   :  { %v1291_v53 = vld [vmem:[#allocation10 + $0x18] sm:$0xff] }
0x11bc   :  { %1906 = vtanh.f32 %v1143_v52  ;;  %v1617_v55 = vmul.f32 -1.442695, %v1143_v52  ;;  %v1290_v52 = vld [vmem:[#allocation10 + $0x10] sm:$0xff] }
0x11be   :  { %1908 = vpow2.f32 %v1617_v55  ;;  %v1842_v55 = vpack.c.bf16 %v1291_v53, %v1290_v52 }
0x11c6   :  { %v1907_v54 = vpop.eup %1906 }
0x11c7   :  { %1153 = vrot.lane.b32.xlu0 %v1907_v54, %s2071_s2  ;;  %v1836_v54 = vpack.c.bf16 %v1295_v50, %v1294_v49 }
0x11c8   :  { %v1909_v56 = vpop.eup %1908 }
0x11c9   :  { %v1147_v57 = vadd.f32 1.0, %v1909_v56  ;;  %1837 = vmatpush3.bf16.msra.mxu0 %v1836_v54 }
0x11cb   :  { %1910 = vrcp.f32 %v1147_v57 }
0x11d5   :  { %v1911_v58 = vpop.eup %1910 }
0x11d6   :  { %v1151_v61 = vmul.f32 %v1911_v58, %v1060_v37 }
0x1239   :  { %v1154_v59 = vpop.permute.xlu0 %1153 }
0x123a   :  { %v1156_v60 = vmul.f32 %v1911_v58, %v1154_v59 }
0x123c   :  { %1158 = vrot.lane.b32.xlu1 %v1156_v60, %s2072_s29 }
0x12ae   :  { %v1159_v62 = vpop.permute.xlu1 %1158 }
0x12af   :  { %v2305_v63 = vadd.f32 %v1159_v62, %v1151_v61 }
0x12b1   :  { %1912 = vtanh.f32 %v2305_v63 }
0x12bb   :  { %v1913_v2 = vpop.eup %1912 }
0x12bc   :  { %1164 = vrot.lane.b32.xlu0 %v1913_v2, %s2071_s2 }
0x132e   :  { %v1165_v11 = vpop.permute.xlu0 %1164 }
0x132f   :  { %v1167_v14 = vmul.f32 %v1911_v58, %v1165_v11 }
0x1331   :  { %1170 = vrot.lane.b32.xlu1 %v1167_v14, %s2072_s29 }
0x13a3   :  { %v1171_v15 = vpop.permute.xlu1 %1170 }
0x13a4   :  { %1760 = vmatmul.mubr.msk.f32.vlgmr.msra.gmra.mrb[6].mxu1 %vm463_vm1, %v1171_v15 }
0x13a5   :  { %1781 = vmatprep.mubr.msk.f32.mxu1 %vm2069_vm0, %v2070_v1  ;;  %v411_v1 = vld [vmem:[%s410_s10] sm:$0x1]  ;;  %1840 = vmatpush3.bf16.msra.mxu1 %v1839_v51 }
0x13a6   :  { %412 = vst [vmem:[#allocation2 + $0x46] sm:$0x1] %v411_v1  ;;  %1841 = vmatprep.subr.bf16.mxu1 %v2068_v0 }
0x13a9   :  { %1843 = vmatpush3.bf16.msra.mxu1 %v1842_v55 }
0x13ad   :  { %v1269_v27 = vld [vmem:[#allocation2 + $0x40] sm:$0xff] }
0x13ae   :  { %v1620_v31 = vmul.f32 -1.442695, %v1269_v27 }
0x1477   :  { %v1240_v24 = vpop.f32.mrb[6].mxu1 }
0x1478   :  { %v1244_v25 = vadd.f32 %v1240_v24, %v1168_v23  ;;  %v1761_v26 = vpop.f32.mrb[7].mxu1 }
0x147a   :  { %1914 = vtanh.f32 %v1244_v25  ;;  %v1619_v30 = vmul.f32 -1.442695, %v1244_v25 }
0x147b   :  { %1916 = vtanh.f32 %v1269_v27 }
0x147c   :  { %1918 = vpow2.f32 %v1619_v30 }
0x147d   :  { %1920 = vpow2.f32 %v1620_v31 }
0x1484   :  { %v1915_v28 = vpop.eup %1914 }
0x1485   :  { %1254 = vrot.lane.b32.xlu0 %v1915_v28, %s2071_s2  ;;  %v1917_v29 = vpop.eup %1916 }
0x1486   :  { %v1919_v5 = vpop.eup %1918 }
0x1487   :  { %v1921_v32 = vpop.eup %1920  ;;  %v1248_v33 = vadd.f32 1.0, %v1919_v5 }
0x1488   :  { %v1273_v34 = vadd.f32 1.0, %v1921_v32 }
0x1489   :  { %1278 = vrot.lane.b32.xlu0 %v1917_v29, %s2071_s2  ;;  %1922 = vrcp.f32 %v1248_v33 }
0x148a   :  { %1924 = vrcp.f32 %v1273_v34 }
0x1493   :  { %v1923_v35 = vpop.eup %1922 }
0x1494   :  { %v1925_v37 = vpop.eup %1924  ;;  %v1252_v41 = vmul.f32 %v1923_v35, %v2305_v63 }
0x14f7   :  { %v1255_v10 = vpop.permute.xlu0 %1254 }
0x14f8   :  { %v1257_v36 = vmul.f32 %v1923_v35, %v1255_v10 }
0x14fa   :  { %1259 = vrot.lane.b32.xlu1 %v1257_v36, %s2072_s29 }
0x14fb   :  { %v1279_v38 = vpop.permute.xlu0 %1278 }
0x14fc   :  { %v1281_v39 = vmul.f32 %v1925_v37, %v1279_v38 }
0x14fe   :  { %1926 = vtanh.f32 %v1281_v39 }
0x1508   :  { %v1927_v40 = vpop.eup %1926 }
0x1509   :  { %1284 = vrot.lane.b32.xlu0 %v1927_v40, %s2073_s4 }
0x156c   :  { %v1260_v42 = vpop.permute.xlu1 %1259 }
0x156d   :  { %v1262_v43 = vadd.f32 %v1260_v42, %v1252_v41 }
0x156f   :  { %1928 = vtanh.f32 %v1262_v43 }
0x1579   :  { %v1929_v56 = vpop.eup %1928 }
0x157a   :  { %1265 = vrot.lane.b32.xlu1 %v1929_v56, %s2071_s2 }
0x157b   :  { %v1285_v57 = vpop.permute.xlu0 %1284 }
0x157c   :  { %v1287_v58 = vmul.f32 %v1925_v37, %v1285_v57 }
0x157e   :  { %1297 = vrot.lane.b32.xlu1 %v1287_v58, %s2072_s29 }
0x15ec   :  { %v1266_v59 = vpop.permute.xlu1 %1265 }
0x15ed   :  { %v1268_v60 = vmul.f32 %v1923_v35, %v1266_v59 }
0x15ef   :  { %1372 = vrot.lane.b32.xlu0 %v1268_v60, %s2072_s29 }
0x15f0   :  { %v1298_v61 = vpop.permute.xlu1 %1297 }
0x15f1   :  { %1771 = vmatmul.mubr.msk.f32.vlgmr.msra.gmra.mrb[8].mxu0 %vm463_vm1, %v1298_v61 }
0x1661   :  { %v1373_v62 = vpop.permute.xlu0 %1372 }
0x1662   :  { %1782 = vmatmul.mubr.msk.f32.vlgmr.msra.gmra.mrb[8].mxu1 %vm463_vm1, %v1373_v62 }
0x16c4   :  { %v1367_v0 = vpop.f32.mrb[8].mxu0 }
0x16c5   :  { %v1772_v63 = vpop.f32.mrb[9].mxu0 }
0x1735   :  { %v1442_v2 = vpop.f32.mrb[8].mxu1 }
0x1736   :  { %v1443_v4 = vadd.f32 %v1442_v2, %v1367_v0  ;;  %v1783_v6 = vpop.f32.mrb[9].mxu1 }
0x1738   :  { %v1453_v7 = vadd.f32 %v1623_v3, %v1443_v4 }
0x173a   :  { %1454 = vst [vmem:[%s2369_s7] sm:$0xff] %v1453_v7 }
0x173b   :  { %1459 = vsyncpa [#allocation6], 1 }
0x173c   :  { %1460 = vsyncpa [#allocation8], 1 }
0x173d   :  { %1461 = vsyncpa [#allocation11], 1 }

</bundles_post_ra>
